<compile_context>
chip_gen: v5e
topology: v5e:2x2
jax: 0.10.0
libtpu: 0.0.40
codegen_flags: <defaults>
</compile_context>

<pallas_src>
import jax
import jax.numpy as jnp
from jax import lax
from jax.experimental import pallas as pl
from jax.experimental.pallas import tpu as pltpu

H = 35          # real hidden size (matches nn.LSTM(1, 35))
HP = 128        # lane-padded hidden size
G4 = 4 * HP     # packed gate width (i | f | o | g)
IN = 1          # input_size
OUT = 1         # output_size

# packed gate slot -> PyTorch gate chunk (torch order is i, f, g, o)
GATE_SRC = (0, 1, 3, 2)   # packed i, f, o, g


def lstm_kernel(seq_ref, w_ih_ref, b_ref, w_hh_ref, w_lin_ref, b_lin_ref,
                out_ref, gx_ref):
    """Sequential LSTM recurrence + final Linear in one kernel invocation.

    seq_ref   : VMEM (T, 1)     f32  -- input sequence as a column
    w_ih_ref  : VMEM (1, 4*HP)  f32  -- input->gates weights (packed, padded)
    b_ref     : VMEM (1, 4*HP)  f32  -- b_ih + b_hh (packed, padded)
    w_hh_ref  : VMEM (HP, 4*HP) f32  -- hidden->gates weights (packed, padded)
    w_lin_ref : VMEM (1, HP)    f32  -- final linear weight row (cols 0:H real)
    b_lin_ref : VMEM (1, HP)    f32  -- final linear bias (col 0 real, rest 0)
    out_ref   : VMEM (1, HP)    f32  -- prediction at last timestep in [0, 0]
    gx_ref    : VMEM (T, 4*HP)  f32  -- scratch: per-step input-gate slab
    """
    T = gx_ref.shape[0]

    # Input-gate contribution for ALL timesteps in one vectorized VPU op,
    # computed in-kernel (no wrapper dispatch, no HBM round-trip) and parked
    # in VMEM scratch; it is not on the per-step serial critical path.
    gx_ref[...] = seq_ref[...] * w_ih_ref[...] + b_ref[...]

    # Recurrent weights: loaded once, reused across the whole unrolled chain.
    w_hh = w_hh_ref[...]                                    # (HP, 4*HP) f32

    h0 = jnp.zeros((1, HP), jnp.float32)
    c0 = jnp.zeros((1, HP), jnp.float32)

    def step(t, carry):
        h, c = carry
        # recurrent contribution on the MXU, f32 operands / f32 accumulate
        gates = (gx_ref[pl.ds(t, 1), :]
                 + jnp.dot(h, w_hh, preferred_element_type=jnp.float32))
        # gate order i | f | o | g: one sigmoid over 3*HP lanes, one tanh
        sig = jax.nn.sigmoid(gates[:, :3 * HP])
        i = sig[:, 0 * HP:1 * HP]
        f = sig[:, 1 * HP:2 * HP]
        o = sig[:, 2 * HP:3 * HP]
        g = jnp.tanh(gates[:, 3 * HP:4 * HP])
        # padded lanes: gx/w_hh-cols/h0/c0 are zero => g_pad = 0 => c,h stay 0
        c_new = f * c + i * g
        h_new = o * jnp.tanh(c_new)
        return h_new, c_new

    # full unroll for small static T gives the scheduler cross-step overlap;
    # unroll=8 fallback keeps gx loads on whole (8,128) tiles for long T.
    h, _ = lax.fori_loop(0, T, step, (h0, c0),
                         unroll=True if T <= 64 else 8)

    # Final Linear on the last hidden state (== pred[-1] in the torch module):
    # VPU multiply + lane reduction instead of an MXU matmul for one scalar.
    # NOTE: only out_ref[0, 0] is meaningful; lanes >= 1 hold the bias-less
    # reduction broadcast and must not be read by callers.
    out_ref[...] = (jnp.sum(h * w_lin_ref[...], axis=-1, keepdims=True)
                    + b_lin_ref[...])


def lstm_forward(seq, w_ih_pad, b_pad, w_hh_pad, w_lin_row, b_lin_row):
    """seq: (T,) f32.  Returns shape (1,) -- the prediction at the last step."""
    T = seq.shape[0]
    seq_col = seq.reshape(T, 1)   # layout only; all compute happens in-kernel

    out = pl.pallas_call(
        lstm_kernel,
        out_shape=jax.ShapeDtypeStruct((1, HP), jnp.float32),
        in_specs=[
            pl.BlockSpec(memory_space=pltpu.MemorySpace.VMEM),   # seq column
            pl.BlockSpec(memory_space=pltpu.MemorySpace.VMEM),   # w_ih row
            pl.BlockSpec(memory_space=pltpu.MemorySpace.VMEM),   # bias row
            pl.BlockSpec(memory_space=pltpu.MemorySpace.VMEM),   # w_hh
            pl.BlockSpec(memory_space=pltpu.MemorySpace.VMEM),   # w_lin row
            pl.BlockSpec(memory_space=pltpu.MemorySpace.VMEM),   # b_lin row
        ],
        out_specs=pl.BlockSpec(memory_space=pltpu.MemorySpace.VMEM),
        scratch_shapes=[pltpu.VMEM((T, G4), jnp.float32)],       # gates_x slab
    )(seq_col, w_ih_pad, b_pad, w_hh_pad, w_lin_row, b_lin_row)
    return out[0, :1]   # shape (1,) == pred[-1] in the torch module


lstm_forward = jax.jit(lstm_forward)


def make_params(key):
    """Deterministic parameters with PyTorch-style shapes and U(-k, k) init."""
    k_lstm = 1.0 / jnp.sqrt(H)
    keys = jax.random.split(key, 6)
    w_ih = jax.random.uniform(keys[0], (4 * H, IN), jnp.float32, -k_lstm, k_lstm)
    w_hh = jax.random.uniform(keys[1], (4 * H, H), jnp.float32, -k_lstm, k_lstm)
    b_ih = jax.random.uniform(keys[2], (4 * H,), jnp.float32, -k_lstm, k_lstm)
    b_hh = jax.random.uniform(keys[3], (4 * H,), jnp.float32, -k_lstm, k_lstm)
    w_lin = jax.random.uniform(keys[4], (OUT, H), jnp.float32, -k_lstm, k_lstm)
    b_lin = jax.random.uniform(keys[5], (OUT,), jnp.float32, -k_lstm, k_lstm)
    return w_ih, w_hh, b_ih, b_hh, w_lin, b_lin


def pack_params(w_ih, w_hh, b_ih, b_hh, w_lin, b_lin):
    """Pack PyTorch-layout weights into the lane-padded kernel layout.

    Gate order is reordered from torch's (i, f, g, o) to (i, f, o, g) so the
    sigmoid gates are contiguous in the packed lane axis.  All padding lanes
    are exactly zero (required by the padded-lane invariant in the kernel).
    """
    w_ih_pad = jnp.zeros((1, G4), jnp.float32)
    w_hh_pad = jnp.zeros((HP, G4), jnp.float32)
    b_pad = jnp.zeros((1, G4), jnp.float32)
    for dst, src in enumerate(GATE_SRC):
        rows = slice(src * H, (src + 1) * H)
        cols = slice(dst * HP, dst * HP + H)
        w_ih_pad = w_ih_pad.at[0, cols].set(w_ih[rows, 0])
        w_hh_pad = w_hh_pad.at[:H, cols].set(w_hh[rows, :].T)   # gates = h @ W_hh^T
        b_pad = b_pad.at[0, cols].set(b_ih[rows] + b_hh[rows])
    w_lin_row = jnp.zeros((1, HP), jnp.float32).at[0, :H].set(w_lin[0, :])
    b_lin_row = jnp.zeros((1, HP), jnp.float32).at[0, 0].set(b_lin[0])
    return w_ih_pad, b_pad, w_hh_pad, w_lin_row, b_lin_row


def lstm_ref(seq, w_ih, w_hh, b_ih, b_hh, w_lin, b_lin):
    """Pure-JAX f32 reference matching torch.nn.LSTM + Linear semantics."""
    h = jnp.zeros((H,), jnp.float32)
    c = jnp.zeros((H,), jnp.float32)
    for t in range(seq.shape[0]):
        gates = w_ih[:, 0] * seq[t] + w_hh @ h + b_ih + b_hh
        i = jax.nn.sigmoid(gates[0 * H:1 * H])
        f = jax.nn.sigmoid(gates[1 * H:2 * H])
        g = jnp.tanh(gates[2 * H:3 * H])
        o = jax.nn.sigmoid(gates[3 * H:4 * H])
        c = f * c + i * g
        h = o * jnp.tanh(c)
    return w_lin @ h + b_lin   # shape (1,)


if __name__ == "__main__":
    key = jax.random.PRNGKey(0)
    k_seq, k_par = jax.random.split(key)

    T = 8
    seq = jax.random.normal(k_seq, (T,), jnp.float32)   # 1-D time series

    params = make_params(k_par)
    packed = pack_params(*params)

    pred = lstm_forward(seq, *packed)
    pred = jax.block_until_ready(pred)

    ref = lstm_ref(seq, *params)
    assert pred.shape == (1,)
    # all-f32 path (MXU f32 dot + f32 elementwise): tight tolerance again.
    assert jnp.allclose(pred, ref, atol=1e-4, rtol=1e-4), (pred, ref)

    print("KERNEL_OK")
</pallas_src>

<mosaic_0001>
module attributes {stable_mosaic.version = 11 : i64} {
  func.func @lstm_kernel(%arg0: memref<8x1xf32, #tpu.memory_space<vmem>>, %arg1: memref<1x512xf32, #tpu.memory_space<vmem>>, %arg2: memref<1x512xf32, #tpu.memory_space<vmem>>, %arg3: memref<128x512xf32, #tpu.memory_space<vmem>>, %arg4: memref<1x128xf32, #tpu.memory_space<vmem>>, %arg5: memref<1x128xf32, #tpu.memory_space<vmem>>, %arg6: memref<1x128xf32, #tpu.memory_space<vmem>>, %arg7: memref<8x512xf32, #tpu.memory_space<vmem>>) attributes {dimension_semantics = [], scalar_prefetch = 0 : i64, scratch_operands = 1 : i64, tpu.core_type = #tpu.core_type<tc>} {
    %c0 = arith.constant 0 : index
    %c0_0 = arith.constant 0 : index
    %0 = vector.load %arg0[%c0, %c0_0] : memref<8x1xf32, #tpu.memory_space<vmem>>, vector<8x1xf32>
    %c0_1 = arith.constant 0 : index
    %c0_2 = arith.constant 0 : index
    %1 = vector.load %arg1[%c0_1, %c0_2] : memref<1x512xf32, #tpu.memory_space<vmem>>, vector<1x512xf32>
    %2 = vector.broadcast %0 : vector<8x1xf32> to vector<8x512xf32>
    %3 = vector.broadcast %1 : vector<1x512xf32> to vector<8x512xf32>
    %4 = arith.mulf %2, %3 : vector<8x512xf32>
    %c0_3 = arith.constant 0 : index
    %c0_4 = arith.constant 0 : index
    %5 = vector.load %arg2[%c0_3, %c0_4] : memref<1x512xf32, #tpu.memory_space<vmem>>, vector<1x512xf32>
    %6 = vector.broadcast %5 : vector<1x512xf32> to vector<8x512xf32>
    %7 = arith.addf %4, %6 : vector<8x512xf32>
    %c0_5 = arith.constant 0 : index
    %c0_6 = arith.constant 0 : index
    %8 = vector.load %arg7[%c0_5, %c0_6] : memref<8x512xf32, #tpu.memory_space<vmem>>, vector<8x512xf32>
    tpu.vector_store %arg7[%c0_5, %c0_6], %7 {strides = array<i32>} : memref<8x512xf32, #tpu.memory_space<vmem>>, vector<8x512xf32>,
    %c0_7 = arith.constant 0 : index
    %c0_8 = arith.constant 0 : index
    %9 = vector.load %arg3[%c0_7, %c0_8] : memref<128x512xf32, #tpu.memory_space<vmem>>, vector<128x512xf32>
    %cst = arith.constant 0.000000e+00 : f32
    %10 = vector.broadcast %cst : f32 to vector<1x128xf32>
    %cst_9 = arith.constant 0.000000e+00 : f32
    %11 = vector.broadcast %cst_9 : f32 to vector<1x128xf32>
    %c0_i32 = arith.constant 0 : i32
    %12 = arith.index_cast %c0_i32 : i32 to index
    %c0_10 = arith.constant 0 : index
    %13 = vector.load %arg7[%12, %c0_10] : memref<8x512xf32, #tpu.memory_space<vmem>>, vector<1x512xf32>
    %cst_11 = arith.constant dense<0.000000e+00> : vector<1x512xf32>
    %14 = tpu.matmul %10, %9, %cst_11 {dimension_numbers = #tpu.dot_dimension_numbers<[1], [0], [0], [1], [0, 0, 1, 1], [], []>} : vector<1x128xf32>, vector<128x512xf32>, vector<1x512xf32> -> vector<1x512xf32>
    %15 = arith.addf %13, %14 : vector<1x512xf32>
    %16 = vector.extract_strided_slice %15 {offsets = [0, 0], sizes = [1, 384], strides = [1, 1]} : vector<1x512xf32> to vector<1x384xf32>
    %17 = arith.negf %16 : vector<1x384xf32>
    %18 = math.exp %17 : vector<1x384xf32>
    %cst_12 = arith.constant 1.000000e+00 : f32
    %19 = vector.broadcast %cst_12 : f32 to vector<1x384xf32>
    %20 = arith.addf %19, %18 : vector<1x384xf32>
    %21 = arith.divf %19, %20 : vector<1x384xf32>
    %22 = vector.extract_strided_slice %21 {offsets = [0, 0], sizes = [1, 128], strides = [1, 1]} : vector<1x384xf32> to vector<1x128xf32>
    %23 = vector.extract_strided_slice %21 {offsets = [0, 128], sizes = [1, 128], strides = [1, 1]} : vector<1x384xf32> to vector<1x128xf32>
    %24 = vector.extract_strided_slice %21 {offsets = [0, 256], sizes = [1, 128], strides = [1, 1]} : vector<1x384xf32> to vector<1x128xf32>
    %25 = vector.extract_strided_slice %15 {offsets = [0, 384], sizes = [1, 128], strides = [1, 1]} : vector<1x512xf32> to vector<1x128xf32>
    %26 = math.tanh %25 : vector<1x128xf32>
    %27 = arith.mulf %23, %11 : vector<1x128xf32>
    %28 = arith.mulf %22, %26 : vector<1x128xf32>
    %29 = arith.addf %27, %28 : vector<1x128xf32>
    %30 = math.tanh %29 : vector<1x128xf32>
    %31 = arith.mulf %24, %30 : vector<1x128xf32>
    %c1_i32 = arith.constant 1 : i32
    %32 = arith.index_cast %c1_i32 : i32 to index
    %c0_13 = arith.constant 0 : index
    %33 = vector.load %arg7[%32, %c0_13] : memref<8x512xf32, #tpu.memory_space<vmem>>, vector<1x512xf32>
    %cst_14 = arith.constant dense<0.000000e+00> : vector<1x512xf32>
    %34 = tpu.matmul %31, %9, %cst_14 {dimension_numbers = #tpu.dot_dimension_numbers<[1], [0], [0], [1], [0, 0, 1, 1], [], []>} : vector<1x128xf32>, vector<128x512xf32>, vector<1x512xf32> -> vector<1x512xf32>
    %35 = arith.addf %33, %34 : vector<1x512xf32>
    %36 = vector.extract_strided_slice %35 {offsets = [0, 0], sizes = [1, 384], strides = [1, 1]} : vector<1x512xf32> to vector<1x384xf32>
    %37 = arith.negf %36 : vector<1x384xf32>
    %38 = math.exp %37 : vector<1x384xf32>
    %cst_15 = arith.constant 1.000000e+00 : f32
    %39 = vector.broadcast %cst_15 : f32 to vector<1x384xf32>
    %40 = arith.addf %39, %38 : vector<1x384xf32>
    %41 = arith.divf %39, %40 : vector<1x384xf32>
    %42 = vector.extract_strided_slice %41 {offsets = [0, 0], sizes = [1, 128], strides = [1, 1]} : vector<1x384xf32> to vector<1x128xf32>
    %43 = vector.extract_strided_slice %41 {offsets = [0, 128], sizes = [1, 128], strides = [1, 1]} : vector<1x384xf32> to vector<1x128xf32>
    %44 = vector.extract_strided_slice %41 {offsets = [0, 256], sizes = [1, 128], strides = [1, 1]} : vector<1x384xf32> to vector<1x128xf32>
    %45 = vector.extract_strided_slice %35 {offsets = [0, 384], sizes = [1, 128], strides = [1, 1]} : vector<1x512xf32> to vector<1x128xf32>
    %46 = math.tanh %45 : vector<1x128xf32>
    %47 = arith.mulf %43, %29 : vector<1x128xf32>
    %48 = arith.mulf %42, %46 : vector<1x128xf32>
    %49 = arith.addf %47, %48 : vector<1x128xf32>
    %50 = math.tanh %49 : vector<1x128xf32>
    %51 = arith.mulf %44, %50 : vector<1x128xf32>
    %c2_i32 = arith.constant 2 : i32
    %52 = arith.index_cast %c2_i32 : i32 to index
    %c0_16 = arith.constant 0 : index
    %53 = vector.load %arg7[%52, %c0_16] : memref<8x512xf32, #tpu.memory_space<vmem>>, vector<1x512xf32>
    %cst_17 = arith.constant dense<0.000000e+00> : vector<1x512xf32>
    %54 = tpu.matmul %51, %9, %cst_17 {dimension_numbers = #tpu.dot_dimension_numbers<[1], [0], [0], [1], [0, 0, 1, 1], [], []>} : vector<1x128xf32>, vector<128x512xf32>, vector<1x512xf32> -> vector<1x512xf32>
    %55 = arith.addf %53, %54 : vector<1x512xf32>
    %56 = vector.extract_strided_slice %55 {offsets = [0, 0], sizes = [1, 384], strides = [1, 1]} : vector<1x512xf32> to vector<1x384xf32>
    %57 = arith.negf %56 : vector<1x384xf32>
    %58 = math.exp %57 : vector<1x384xf32>
    %cst_18 = arith.constant 1.000000e+00 : f32
    %59 = vector.broadcast %cst_18 : f32 to vector<1x384xf32>
    %60 = arith.addf %59, %58 : vector<1x384xf32>
    %61 = arith.divf %59, %60 : vector<1x384xf32>
    %62 = vector.extract_strided_slice %61 {offsets = [0, 0], sizes = [1, 128], strides = [1, 1]} : vector<1x384xf32> to vector<1x128xf32>
    %63 = vector.extract_strided_slice %61 {offsets = [0, 128], sizes = [1, 128], strides = [1, 1]} : vector<1x384xf32> to vector<1x128xf32>
    %64 = vector.extract_strided_slice %61 {offsets = [0, 256], sizes = [1, 128], strides = [1, 1]} : vector<1x384xf32> to vector<1x128xf32>
    %65 = vector.extract_strided_slice %55 {offsets = [0, 384], sizes = [1, 128], strides = [1, 1]} : vector<1x512xf32> to vector<1x128xf32>
    %66 = math.tanh %65 : vector<1x128xf32>
    %67 = arith.mulf %63, %49 : vector<1x128xf32>
    %68 = arith.mulf %62, %66 : vector<1x128xf32>
    %69 = arith.addf %67, %68 : vector<1x128xf32>
    %70 = math.tanh %69 : vector<1x128xf32>
    %71 = arith.mulf %64, %70 : vector<1x128xf32>
    %c3_i32 = arith.constant 3 : i32
    %72 = arith.index_cast %c3_i32 : i32 to index
    %c0_19 = arith.constant 0 : index
    %73 = vector.load %arg7[%72, %c0_19] : memref<8x512xf32, #tpu.memory_space<vmem>>, vector<1x512xf32>
    %cst_20 = arith.constant dense<0.000000e+00> : vector<1x512xf32>
    %74 = tpu.matmul %71, %9, %cst_20 {dimension_numbers = #tpu.dot_dimension_numbers<[1], [0], [0], [1], [0, 0, 1, 1], [], []>} : vector<1x128xf32>, vector<128x512xf32>, vector<1x512xf32> -> vector<1x512xf32>
    %75 = arith.addf %73, %74 : vector<1x512xf32>
    %76 = vector.extract_strided_slice %75 {offsets = [0, 0], sizes = [1, 384], strides = [1, 1]} : vector<1x512xf32> to vector<1x384xf32>
    %77 = arith.negf %76 : vector<1x384xf32>
    %78 = math.exp %77 : vector<1x384xf32>
    %cst_21 = arith.constant 1.000000e+00 : f32
    %79 = vector.broadcast %cst_21 : f32 to vector<1x384xf32>
    %80 = arith.addf %79, %78 : vector<1x384xf32>
    %81 = arith.divf %79, %80 : vector<1x384xf32>
    %82 = vector.extract_strided_slice %81 {offsets = [0, 0], sizes = [1, 128], strides = [1, 1]} : vector<1x384xf32> to vector<1x128xf32>
    %83 = vector.extract_strided_slice %81 {offsets = [0, 128], sizes = [1, 128], strides = [1, 1]} : vector<1x384xf32> to vector<1x128xf32>
    %84 = vector.extract_strided_slice %81 {offsets = [0, 256], sizes = [1, 128], strides = [1, 1]} : vector<1x384xf32> to vector<1x128xf32>
    %85 = vector.extract_strided_slice %75 {offsets = [0, 384], sizes = [1, 128], strides = [1, 1]} : vector<1x512xf32> to vector<1x128xf32>
    %86 = math.tanh %85 : vector<1x128xf32>
    %87 = arith.mulf %83, %69 : vector<1x128xf32>
    %88 = arith.mulf %82, %86 : vector<1x128xf32>
    %89 = arith.addf %87, %88 : vector<1x128xf32>
    %90 = math.tanh %89 : vector<1x128xf32>
    %91 = arith.mulf %84, %90 : vector<1x128xf32>
    %c4_i32 = arith.constant 4 : i32
    %92 = arith.index_cast %c4_i32 : i32 to index
    %c0_22 = arith.constant 0 : index
    %93 = vector.load %arg7[%92, %c0_22] : memref<8x512xf32, #tpu.memory_space<vmem>>, vector<1x512xf32>
    %cst_23 = arith.constant dense<0.000000e+00> : vector<1x512xf32>
    %94 = tpu.matmul %91, %9, %cst_23 {dimension_numbers = #tpu.dot_dimension_numbers<[1], [0], [0], [1], [0, 0, 1, 1], [], []>} : vector<1x128xf32>, vector<128x512xf32>, vector<1x512xf32> -> vector<1x512xf32>
    %95 = arith.addf %93, %94 : vector<1x512xf32>
    %96 = vector.extract_strided_slice %95 {offsets = [0, 0], sizes = [1, 384], strides = [1, 1]} : vector<1x512xf32> to vector<1x384xf32>
    %97 = arith.negf %96 : vector<1x384xf32>
    %98 = math.exp %97 : vector<1x384xf32>
    %cst_24 = arith.constant 1.000000e+00 : f32
    %99 = vector.broadcast %cst_24 : f32 to vector<1x384xf32>
    %100 = arith.addf %99, %98 : vector<1x384xf32>
    %101 = arith.divf %99, %100 : vector<1x384xf32>
    %102 = vector.extract_strided_slice %101 {offsets = [0, 0], sizes = [1, 128], strides = [1, 1]} : vector<1x384xf32> to vector<1x128xf32>
    %103 = vector.extract_strided_slice %101 {offsets = [0, 128], sizes = [1, 128], strides = [1, 1]} : vector<1x384xf32> to vector<1x128xf32>
    %104 = vector.extract_strided_slice %101 {offsets = [0, 256], sizes = [1, 128], strides = [1, 1]} : vector<1x384xf32> to vector<1x128xf32>
    %105 = vector.extract_strided_slice %95 {offsets = [0, 384], sizes = [1, 128], strides = [1, 1]} : vector<1x512xf32> to vector<1x128xf32>
    %106 = math.tanh %105 : vector<1x128xf32>
    %107 = arith.mulf %103, %89 : vector<1x128xf32>
    %108 = arith.mulf %102, %106 : vector<1x128xf32>
    %109 = arith.addf %107, %108 : vector<1x128xf32>
    %110 = math.tanh %109 : vector<1x128xf32>
    %111 = arith.mulf %104, %110 : vector<1x128xf32>
    %c5_i32 = arith.constant 5 : i32
    %112 = arith.index_cast %c5_i32 : i32 to index
    %c0_25 = arith.constant 0 : index
    %113 = vector.load %arg7[%112, %c0_25] : memref<8x512xf32, #tpu.memory_space<vmem>>, vector<1x512xf32>
    %cst_26 = arith.constant dense<0.000000e+00> : vector<1x512xf32>
    %114 = tpu.matmul %111, %9, %cst_26 {dimension_numbers = #tpu.dot_dimension_numbers<[1], [0], [0], [1], [0, 0, 1, 1], [], []>} : vector<1x128xf32>, vector<128x512xf32>, vector<1x512xf32> -> vector<1x512xf32>
    %115 = arith.addf %113, %114 : vector<1x512xf32>
    %116 = vector.extract_strided_slice %115 {offsets = [0, 0], sizes = [1, 384], strides = [1, 1]} : vector<1x512xf32> to vector<1x384xf32>
    %117 = arith.negf %116 : vector<1x384xf32>
    %118 = math.exp %117 : vector<1x384xf32>
    %cst_27 = arith.constant 1.000000e+00 : f32
    %119 = vector.broadcast %cst_27 : f32 to vector<1x384xf32>
    %120 = arith.addf %119, %118 : vector<1x384xf32>
    %121 = arith.divf %119, %120 : vector<1x384xf32>
    %122 = vector.extract_strided_slice %121 {offsets = [0, 0], sizes = [1, 128], strides = [1, 1]} : vector<1x384xf32> to vector<1x128xf32>
    %123 = vector.extract_strided_slice %121 {offsets = [0, 128], sizes = [1, 128], strides = [1, 1]} : vector<1x384xf32> to vector<1x128xf32>
    %124 = vector.extract_strided_slice %121 {offsets = [0, 256], sizes = [1, 128], strides = [1, 1]} : vector<1x384xf32> to vector<1x128xf32>
    %125 = vector.extract_strided_slice %115 {offsets = [0, 384], sizes = [1, 128], strides = [1, 1]} : vector<1x512xf32> to vector<1x128xf32>
    %126 = math.tanh %125 : vector<1x128xf32>
    %127 = arith.mulf %123, %109 : vector<1x128xf32>
    %128 = arith.mulf %122, %126 : vector<1x128xf32>
    %129 = arith.addf %127, %128 : vector<1x128xf32>
    %130 = math.tanh %129 : vector<1x128xf32>
    %131 = arith.mulf %124, %130 : vector<1x128xf32>
    %c6_i32 = arith.constant 6 : i32
    %132 = arith.index_cast %c6_i32 : i32 to index
    %c0_28 = arith.constant 0 : index
    %133 = vector.load %arg7[%132, %c0_28] : memref<8x512xf32, #tpu.memory_space<vmem>>, vector<1x512xf32>
    %cst_29 = arith.constant dense<0.000000e+00> : vector<1x512xf32>
    %134 = tpu.matmul %131, %9, %cst_29 {dimension_numbers = #tpu.dot_dimension_numbers<[1], [0], [0], [1], [0, 0, 1, 1], [], []>} : vector<1x128xf32>, vector<128x512xf32>, vector<1x512xf32> -> vector<1x512xf32>
    %135 = arith.addf %133, %134 : vector<1x512xf32>
    %136 = vector.extract_strided_slice %135 {offsets = [0, 0], sizes = [1, 384], strides = [1, 1]} : vector<1x512xf32> to vector<1x384xf32>
    %137 = arith.negf %136 : vector<1x384xf32>
    %138 = math.exp %137 : vector<1x384xf32>
    %cst_30 = arith.constant 1.000000e+00 : f32
    %139 = vector.broadcast %cst_30 : f32 to vector<1x384xf32>
    %140 = arith.addf %139, %138 : vector<1x384xf32>
    %141 = arith.divf %139, %140 : vector<1x384xf32>
    %142 = vector.extract_strided_slice %141 {offsets = [0, 0], sizes = [1, 128], strides = [1, 1]} : vector<1x384xf32> to vector<1x128xf32>
    %143 = vector.extract_strided_slice %141 {offsets = [0, 128], sizes = [1, 128], strides = [1, 1]} : vector<1x384xf32> to vector<1x128xf32>
    %144 = vector.extract_strided_slice %141 {offsets = [0, 256], sizes = [1, 128], strides = [1, 1]} : vector<1x384xf32> to vector<1x128xf32>
    %145 = vector.extract_strided_slice %135 {offsets = [0, 384], sizes = [1, 128], strides = [1, 1]} : vector<1x512xf32> to vector<1x128xf32>
    %146 = math.tanh %145 : vector<1x128xf32>
    %147 = arith.mulf %143, %129 : vector<1x128xf32>
    %148 = arith.mulf %142, %146 : vector<1x128xf32>
    %149 = arith.addf %147, %148 : vector<1x128xf32>
    %150 = math.tanh %149 : vector<1x128xf32>
    %151 = arith.mulf %144, %150 : vector<1x128xf32>
    %c7_i32 = arith.constant 7 : i32
    %152 = arith.index_cast %c7_i32 : i32 to index
    %c0_31 = arith.constant 0 : index
    %153 = vector.load %arg7[%152, %c0_31] : memref<8x512xf32, #tpu.memory_space<vmem>>, vector<1x512xf32>
    %cst_32 = arith.constant dense<0.000000e+00> : vector<1x512xf32>
    %154 = tpu.matmul %151, %9, %cst_32 {dimension_numbers = #tpu.dot_dimension_numbers<[1], [0], [0], [1], [0, 0, 1, 1], [], []>} : vector<1x128xf32>, vector<128x512xf32>, vector<1x512xf32> -> vector<1x512xf32>
    %155 = arith.addf %153, %154 : vector<1x512xf32>
    %156 = vector.extract_strided_slice %155 {offsets = [0, 0], sizes = [1, 384], strides = [1, 1]} : vector<1x512xf32> to vector<1x384xf32>
    %157 = arith.negf %156 : vector<1x384xf32>
    %158 = math.exp %157 : vector<1x384xf32>
    %cst_33 = arith.constant 1.000000e+00 : f32
    %159 = vector.broadcast %cst_33 : f32 to vector<1x384xf32>
    %160 = arith.addf %159, %158 : vector<1x384xf32>
    %161 = arith.divf %159, %160 : vector<1x384xf32>
    %162 = vector.extract_strided_slice %161 {offsets = [0, 0], sizes = [1, 128], strides = [1, 1]} : vector<1x384xf32> to vector<1x128xf32>
    %163 = vector.extract_strided_slice %161 {offsets = [0, 128], sizes = [1, 128], strides = [1, 1]} : vector<1x384xf32> to vector<1x128xf32>
    %164 = vector.extract_strided_slice %161 {offsets = [0, 256], sizes = [1, 128], strides = [1, 1]} : vector<1x384xf32> to vector<1x128xf32>
    %165 = vector.extract_strided_slice %155 {offsets = [0, 384], sizes = [1, 128], strides = [1, 1]} : vector<1x512xf32> to vector<1x128xf32>
    %166 = math.tanh %165 : vector<1x128xf32>
    %167 = arith.mulf %163, %149 : vector<1x128xf32>
    %168 = arith.mulf %162, %166 : vector<1x128xf32>
    %169 = arith.addf %167, %168 : vector<1x128xf32>
    %170 = math.tanh %169 : vector<1x128xf32>
    %171 = arith.mulf %164, %170 : vector<1x128xf32>
    %c8_i32 = arith.constant 8 : i32
    %c0_34 = arith.constant 0 : index
    %c0_35 = arith.constant 0 : index
    %172 = vector.load %arg4[%c0_34, %c0_35] : memref<1x128xf32, #tpu.memory_space<vmem>>, vector<1x128xf32>
    %173 = arith.mulf %171, %172 : vector<1x128xf32>
    %cst_36 = arith.constant dense<0.000000e+00> : vector<1xf32>
    %174 = vector.multi_reduction <add>, %173, %cst_36 [1] : vector<1x128xf32> to vector<1xf32>
    %175 = vector.shape_cast %174 : vector<1xf32> to vector<1x1xf32>
    %c0_37 = arith.constant 0 : index
    %c0_38 = arith.constant 0 : index
    %176 = vector.load %arg5[%c0_37, %c0_38] : memref<1x128xf32, #tpu.memory_space<vmem>>, vector<1x128xf32>
    %177 = vector.broadcast %175 : vector<1x1xf32> to vector<1x128xf32>
    %178 = arith.addf %177, %176 : vector<1x128xf32>
    %c0_39 = arith.constant 0 : index
    %c0_40 = arith.constant 0 : index
    %179 = vector.load %arg6[%c0_39, %c0_40] : memref<1x128xf32, #tpu.memory_space<vmem>>, vector<1x128xf32>
    tpu.vector_store %arg6[%c0_39, %c0_40], %178 {strides = array<i32>} : memref<1x128xf32, #tpu.memory_space<vmem>>, vector<1x128xf32>,
    return
  }
}

</mosaic_0001>

<bundles_post_ra>
// kernel: lstm_forward.1
= control target key start
LH: loop header
LB: loop body
LE: loop exit
PB: predicated region body
PF: predicated region fallthrough
CT: control target
= control target key end

     0   :  { %11 = vsyncpa [#allocation4], 0  ;;  %s2255_s0 = inlined_call_operand.vmem [shape: f32[8,1], index: 0, kind: input, shape index: {}]   ;;  %s2256_s1 = inlined_call_operand.vmem [shape: f32[1,512], index: 1, kind: input, shape index: {}]   ;;  %s2257_s2 = inlined_call_operand.vmem [shape: f32[1,512], index: 2, kind: input, shape index: {}]   ;;  %s2258_s3 = inlined_call_operand.hbm [shape: f32[128,512], index: 3, kind: input, shape index: {}]   ;;  %s2259_s4 = inlined_call_operand.vmem [shape: f32[1,128], index: 4, kind: input, shape index: {}]   ;;  %s2260_s5 = inlined_call_operand.vmem [shape: f32[1,128], index: 5, kind: input, shape index: {}]   ;;  %s2261_s6 = inlined_call_operand.hbm [shape: f32[1,128], index: 6, kind: output, shape index: {}]  }
   0x1   :  { %12 = vsyncpa [#allocation5], 0  ;;  %s23_s23 = sshll.u32 %s2258_s3, 4  ;;  %s1380_s24 = smov [#allocation3]   ;;  %s24_s23 = int_to_ptr.hbm [resolvable:$true] %s23_s23 }
   0x2   :  { %s25_s25 = sshll.u32 %s1380_s24, 4  ;;  %s1381_s26 = smov 512   ;;  %s26_s25 = int_to_ptr.vmem [resolvable:$true] %s25_s25 }
   0x3   :  { %s1382_s27 = smov 32  }
   0x4   :  { %31 = dma.hbm_to_vmem [thread:$0]  %s24_s23, 8192, %s26_s25, [#allocation4], %s1381_s26, %s1381_s26, %s1382_s27  }
   0x5   :  { %1376 = dma.done.wait [#allocation4], 8192  }
   0x6   :  { %1377 = vsyncadd [#allocation4], 4294959104  ;;  %v1424_v0 = vld [vmem:[#allocation3 + $0x1f0] sm:$0xff]  ;;  %v1426_v1 = vld [vmem:[#allocation3 + $0x1f8] sm:$0xff]  ;;  %v1383_v62 = vmov 0.0   ;;  %vm230_vm0 = vcmask 1040384  }
   0x7   :  { %v1428_v2 = vld [vmem:[#allocation3 + $0x1d0] sm:$0xff]  ;;  %183 = vmatpush.msra.mxu2 %v1424_v0  ;;  %203 = vmatpush.msra.mxu3 %v1426_v1  ;;  %v1432_v3 = vld [vmem:[#allocation3 + $0x1d8] sm:$0xff]  ;;  %v1438_v6 = vld [vmem:[#allocation3 + $0x1e8] sm:$0xff]  ;;  %vm232_vm1 = vcmask 1042434   ;;  %vm234_vm2 = vcmask 1041408   ;;  %s1385_s10 = smov [#allocation6]  }
   0x8   :  { %v1434_v4 = vld [vmem:[#allocation3 + $0x1b0] sm:$0xff]  ;;  %v1436_v5 = vld [vmem:[#allocation3 + $0x1b8] sm:$0xff]  ;;  %v1442_v7 = vld [vmem:[#allocation3 + $0x1e0] sm:$0xff]  ;;  %163 = vmatpush.msra.mxu1 %v1438_v6  ;;  %s1173_s11 = sshll.u32 %s1385_s10, 4  ;;  %s1175_s14 = sshll.u32 %s2261_s6, 4  ;;  %s1174_s11 = int_to_ptr.vmem [resolvable:$true] %s1173_s11  ;;  %s1176_s14 = int_to_ptr.hbm [resolvable:$true] %s1175_s14 }
   0x9   :  { %184 = vmatpush.msra.mxu2 %v1428_v2  ;;  %204 = vmatpush.msra.mxu3 %v1432_v3  ;;  %v1444_v8 = vld [vmem:[#allocation3 + $0x1c8] sm:$0xff]  ;;  %v1447_v9 = vld [vmem:[#allocation3 + $0x190] sm:$0xff]  ;;  %v1449_v10 = vld [vmem:[#allocation3 + $0x198] sm:$0xff] }
   0xa   :  { %143 = vmatpush.msra.mxu0 %v1442_v7  ;;  %v1452_v11 = vld [vmem:[#allocation3 + $0x1c0] sm:$0xff]  ;;  %v1456_v12 = vld [vmem:[#allocation3 + $0x1a8] sm:$0xff]  ;;  %164 = vmatpush.msra.mxu1 %v1444_v8  ;;  %v1461_v14 = vld [vmem:[#allocation3 + $0x170] sm:$0xff] }
   0xb   :  { %185 = vmatpush.msra.mxu2 %v1434_v4  ;;  %205 = vmatpush.msra.mxu3 %v1436_v5  ;;  %v1458_v13 = vld [vmem:[#allocation3 + $0x1a0] sm:$0xff]  ;;  %v1463_v15 = vld [vmem:[#allocation3 + $0x178] sm:$0xff]  ;;  %v1468_v16 = vld [vmem:[#allocation3 + $0x188] sm:$0xff] }
   0xc   :  { %144 = vmatpush.msra.mxu0 %v1452_v11  ;;  %v1470_v17 = vld [vmem:[#allocation3 + $0x180] sm:$0xff]  ;;  %165 = vmatpush.msra.mxu1 %v1456_v12  ;;  %v1473_v18 = vld [vmem:[#allocation3 + $0x150] sm:$0xff]  ;;  %v1475_v19 = vld [vmem:[#allocation3 + $0x158] sm:$0xff] }
   0xd   :  { %186 = vmatpush.msra.mxu2 %v1447_v9  ;;  %206 = vmatpush.msra.mxu3 %v1449_v10  ;;  %v1480_v20 = vld [vmem:[#allocation3 + $0x168] sm:$0xff]  ;;  %v1482_v21 = vld [vmem:[#allocation3 + $0x160] sm:$0xff]  ;;  %v1485_v22 = vld [vmem:[#allocation3 + $0x130] sm:$0xff] }
   0xe   :  { %145 = vmatpush.msra.mxu0 %v1458_v13  ;;  %166 = vmatpush.msra.mxu1 %v1468_v16  ;;  %v1487_v23 = vld [vmem:[#allocation3 + $0x138] sm:$0xff]  ;;  %v1492_v24 = vld [vmem:[#allocation3 + $0x148] sm:$0xff]  ;;  %v1494_v25 = vld [vmem:[#allocation3 + $0x140] sm:$0xff] }
   0xf   :  { %187 = vmatpush.msra.mxu2 %v1461_v14  ;;  %207 = vmatpush.msra.mxu3 %v1463_v15  ;;  %v1497_v26 = vld [vmem:[#allocation3 + $0x110] sm:$0xff]  ;;  %v1499_v27 = vld [vmem:[#allocation3 + $0x118] sm:$0xff]  ;;  %v1504_v28 = vld [vmem:[#allocation3 + $0x128] sm:$0xff] }
  0x10   :  { %146 = vmatpush.msra.mxu0 %v1470_v17  ;;  %167 = vmatpush.msra.mxu1 %v1480_v20  ;;  %v1506_v29 = vld [vmem:[#allocation3 + $0x120] sm:$0xff]  ;;  %v1509_v30 = vld [vmem:[#allocation3 + $0xf0] sm:$0xff]  ;;  %v1511_v31 = vld [vmem:[#allocation3 + $0xf8] sm:$0xff] }
  0x11   :  { %188 = vmatpush.msra.mxu2 %v1473_v18  ;;  %208 = vmatpush.msra.mxu3 %v1475_v19  ;;  %v1516_v32 = vld [vmem:[#allocation3 + $0x108] sm:$0xff]  ;;  %v1518_v33 = vld [vmem:[#allocation3 + $0x100] sm:$0xff]  ;;  %v1521_v34 = vld [vmem:[#allocation3 + $0xd0] sm:$0xff] }
  0x12   :  { %147 = vmatpush.msra.mxu0 %v1482_v21  ;;  %168 = vmatpush.msra.mxu1 %v1492_v24  ;;  %v1523_v35 = vld [vmem:[#allocation3 + $0xd8] sm:$0xff]  ;;  %v1528_v36 = vld [vmem:[#allocation3 + $0xe8] sm:$0xff]  ;;  %v1530_v37 = vld [vmem:[#allocation3 + $0xe0] sm:$0xff] }
  0x13   :  { %189 = vmatpush.msra.mxu2 %v1485_v22  ;;  %209 = vmatpush.msra.mxu3 %v1487_v23  ;;  %v1533_v38 = vld [vmem:[#allocation3 + $0xb0] sm:$0xff]  ;;  %v1535_v39 = vld [vmem:[#allocation3 + $0xb8] sm:$0xff]  ;;  %v1540_v40 = vld [vmem:[#allocation3 + $0xc8] sm:$0xff] }
  0x14   :  { %148 = vmatpush.msra.mxu0 %v1494_v25  ;;  %169 = vmatpush.msra.mxu1 %v1504_v28  ;;  %2339 = vst [vmem:[#allocation9_spill] sm:$0xff] %v1533_v38  ;;  %v1542_v41 = vld [vmem:[#allocation3 + $0xc0] sm:$0xff]  ;;  %v1545_v42 = vld [vmem:[#allocation3 + $0x90] sm:$0xff]  ;;  %v1547_v43 = vld [vmem:[#allocation3 + $0x98] sm:$0xff] }
  0x15   :  { %190 = vmatpush.msra.mxu2 %v1497_v26  ;;  %210 = vmatpush.msra.mxu3 %v1499_v27  ;;  %2340 = vst [vmem:[#allocation10_spill] sm:$0xff] %v1535_v39  ;;  %v1552_v44 = vld [vmem:[#allocation3 + $0xa8] sm:$0xff]  ;;  %v1554_v45 = vld [vmem:[#allocation3 + $0xa0] sm:$0xff]  ;;  %v1557_v46 = vld [vmem:[#allocation3 + $0x70] sm:$0xff] }
  0x16   :  { %149 = vmatpush.msra.mxu0 %v1506_v29  ;;  %170 = vmatpush.msra.mxu1 %v1516_v32  ;;  %2341 = vst [vmem:[#allocation11_spill] sm:$0xff] %v1545_v42  ;;  %v1559_v47 = vld [vmem:[#allocation3 + $0x78] sm:$0xff]  ;;  %v1564_v48 = vld [vmem:[#allocation3 + $0x88] sm:$0xff]  ;;  %v1566_v49 = vld [vmem:[#allocation3 + $0x80] sm:$0xff] }
  0x17   :  { %191 = vmatpush.msra.mxu2 %v1509_v30  ;;  %211 = vmatpush.msra.mxu3 %v1511_v31  ;;  %2342 = vst [vmem:[#allocation12_spill] sm:$0xff] %v1547_v43  ;;  %v1569_v50 = vld [vmem:[#allocation3 + $0x50] sm:$0xff]  ;;  %v1571_v51 = vld [vmem:[#allocation3 + $0x58] sm:$0xff]  ;;  %v1576_v52 = vld [vmem:[#allocation3 + $0x68] sm:$0xff] }
  0x18   :  { %150 = vmatpush.msra.mxu0 %v1518_v33  ;;  %171 = vmatpush.msra.mxu1 %v1528_v36  ;;  %2343 = vst [vmem:[#allocation13_spill] sm:$0xff] %v1552_v44  ;;  %v1578_v53 = vld [vmem:[#allocation3 + $0x60] sm:$0xff]  ;;  %v1581_v54 = vld [vmem:[#allocation3 + $0x30] sm:$0xff]  ;;  %v1583_v55 = vld [vmem:[#allocation3 + $0x38] sm:$0xff] }
  0x19   :  { %192 = vmatpush.msra.mxu2 %v1521_v34  ;;  %212 = vmatpush.msra.mxu3 %v1523_v35  ;;  %2344 = vst [vmem:[#allocation14_spill] sm:$0xff] %v1557_v46  ;;  %v1588_v56 = vld [vmem:[#allocation3 + $0x48] sm:$0xff]  ;;  %v1590_v57 = vld [vmem:[#allocation3 + $0x40] sm:$0xff]  ;;  %v1593_v58 = vld [vmem:[#allocation3 + $0x10] sm:$0xff] }
  0x1a   :  { %151 = vmatpush.msra.mxu0 %v1530_v37  ;;  %172 = vmatpush.msra.mxu1 %v1540_v40  ;;  %2345 = vst [vmem:[#allocation15_spill] sm:$0xff] %v1559_v47  ;;  %v1595_v59 = vld [vmem:[#allocation3 + $0x18] sm:$0xff]  ;;  %v1602_v60 = vld [vmem:[#allocation3 + $0x28] sm:$0xff]  ;;  %v1604_v61 = vld [vmem:[#allocation3 + $0x20] sm:$0xff] }
  0x1b   :  { %193 = vmatpush.msra.mxu2 %v1533_v38  ;;  %213 = vmatpush.msra.mxu3 %v1535_v39  ;;  %2346 = vst [vmem:[#allocation16_spill] sm:$0xff] %v1564_v48  ;;  %v1608_v63 = vld [vmem:[#allocation3 + $0x8] sm:$0xff] }
  0x1c   :  { %152 = vmatpush.msra.mxu0 %v1542_v41  ;;  %2347 = vst [vmem:[#allocation17_spill] sm:$0xff] %v1566_v49  ;;  %173 = vmatpush.msra.mxu1 %v1552_v44 }
  0x1d   :  { %194 = vmatpush.msra.mxu2 %v1545_v42  ;;  %214 = vmatpush.msra.mxu3 %v1547_v43  ;;  %2348 = vst [vmem:[#allocation18_spill] sm:$0xff] %v1569_v50 }
  0x1e   :  { %2349 = vst [vmem:[#allocation19_spill] sm:$0xff] %v1571_v51  ;;  %153 = vmatpush.msra.mxu0 %v1554_v45  ;;  %174 = vmatpush.msra.mxu1 %v1564_v48 }
  0x1f   :  { %195 = vmatpush.msra.mxu2 %v1557_v46  ;;  %215 = vmatpush.msra.mxu3 %v1559_v47  ;;  %2350 = vst [vmem:[#allocation20_spill] sm:$0xff] %v1576_v52 }
  0x20   :  { %2351 = vst [vmem:[#allocation21_spill] sm:$0xff] %v1578_v53  ;;  %154 = vmatpush.msra.mxu0 %v1566_v49  ;;  %175 = vmatpush.msra.mxu1 %v1576_v52 }
  0x21   :  { %2352 = vst [vmem:[#allocation22_spill] sm:$0xff] %v1581_v54  ;;  %196 = vmatpush.msra.mxu2 %v1569_v50  ;;  %216 = vmatpush.msra.mxu3 %v1571_v51  ;;  %v40_v51 = vld [vmem:[%s2255_s0] sm:$0xff] }
  0x22   :  { %2353 = vst [vmem:[#allocation23_spill] sm:$0xff] %v1583_v55  ;;  %155 = vmatpush.msra.mxu0 %v1578_v53  ;;  %176 = vmatpush.msra.mxu1 %v1588_v56 }
  0x23   :  { %2354 = vst [vmem:[#allocation24_spill] sm:$0xff] %v1588_v56  ;;  %197 = vmatpush.msra.mxu2 %v1581_v54  ;;  %217 = vmatpush.msra.mxu3 %v1583_v55  ;;  %v1610_v54 = vld [vmem:[#allocation3] sm:$0xff]  ;;  %v1384_v55 = vmov 0  }
  0x24   :  { %2355 = vst [vmem:[#allocation25_spill] sm:$0xff] %v1590_v57  ;;  %156 = vmatpush.msra.mxu0 %v1590_v57  ;;  %177 = vmatpush.msra.mxu1 %v1602_v60 }
  0x25   :  { %2356 = vst [vmem:[#allocation26_spill] sm:$0xff] %v1593_v58  ;;  %198 = vmatpush.msra.mxu2 %v1593_v58  ;;  %218 = vmatpush.msra.mxu3 %v1595_v59 }
  0x26   :  { %2357 = vst [vmem:[#allocation27_spill] sm:$0xff] %v1595_v59  ;;  %199 = vmatmul.f32.vlgmr.msra.gmra.mxu2 %v1383_v62  ;;  %219 = vmatmul.f32.vlgmr.msra.gmra.mxu3 %v1383_v62 }
  0x27   :  { %2358 = vst [vmem:[#allocation28_spill] sm:$0xff] %v1602_v60  ;;  %157 = vmatpush.msra.mxu0 %v1604_v61  ;;  %1199 = vset.pattern.permute.xlu0 %v1384_v55 }
  0x28   :  { %2359 = vst [vmem:[#allocation29_spill] sm:$0xff] %v1604_v61  ;;  %313 = vmatpush.msrb.mxu2 %v1424_v0  ;;  %178 = vmatpush.msra.mxu1 %v1608_v63  ;;  %v2363_v55 = vld [vmem:[#allocation22_spill] sm:$0xff] }
  0x29   :  { %2360 = vst [vmem:[#allocation30_spill] sm:$0xff] %v1608_v63  ;;  %158 = vmatpush.msra.mxu0 %v1610_v54  ;;  %179 = vmatmul.f32.vlgmr.msra.gmra.mxu1 %v1383_v62 }
  0x2a   :  { %2361 = vst [vmem:[#allocation31_spill] sm:$0xff] %v1610_v54  ;;  %159 = vmatmul.f32.vlgmr.msra.gmra.mxu0 %v1383_v62  ;;  %44 = vperm.xlu0 %1199, %v40_v51   ;;  %v2362_v51 = vld [vmem:[#allocation19_spill] sm:$0xff] }
  0x2b   :  { %273 = vmatpush.msrb.mxu0 %v1442_v7  ;;  %293 = vmatpush.msrb.mxu1 %v1438_v6  ;;  %v2364_v62 = vld [vmem:[#allocation23_spill] sm:$0xff] }
  0x2c   :  { %333 = vmatpush.msrb.mxu3 %v1426_v1  ;;  %314 = vmatpush.msrb.mxu2 %v1428_v2 }
  0x2d   :  { %274 = vmatpush.msrb.mxu0 %v1452_v11  ;;  %294 = vmatpush.msrb.mxu1 %v1444_v8 }
  0x2e   :  { %334 = vmatpush.msrb.mxu3 %v1432_v3  ;;  %315 = vmatpush.msrb.mxu2 %v1434_v4 }
  0x2f   :  { %275 = vmatpush.msrb.mxu0 %v1458_v13  ;;  %295 = vmatpush.msrb.mxu1 %v1456_v12 }
  0x30   :  { %335 = vmatpush.msrb.mxu3 %v1436_v5  ;;  %316 = vmatpush.msrb.mxu2 %v1447_v9 }
  0x31   :  { %276 = vmatpush.msrb.mxu0 %v1470_v17  ;;  %296 = vmatpush.msrb.mxu1 %v1468_v16 }
  0x32   :  { %336 = vmatpush.msrb.mxu3 %v1449_v10  ;;  %317 = vmatpush.msrb.mxu2 %v1461_v14 }
  0x33   :  { %277 = vmatpush.msrb.mxu0 %v1482_v21  ;;  %297 = vmatpush.msrb.mxu1 %v1480_v20 }
  0x34   :  { %337 = vmatpush.msrb.mxu3 %v1463_v15  ;;  %318 = vmatpush.msrb.mxu2 %v1473_v18 }
  0x35   :  { %278 = vmatpush.msrb.mxu0 %v1494_v25  ;;  %298 = vmatpush.msrb.mxu1 %v1492_v24 }
  0x36   :  { %338 = vmatpush.msrb.mxu3 %v1475_v19  ;;  %319 = vmatpush.msrb.mxu2 %v1485_v22 }
  0x37   :  { %279 = vmatpush.msrb.mxu0 %v1506_v29  ;;  %299 = vmatpush.msrb.mxu1 %v1504_v28 }
  0x38   :  { %339 = vmatpush.msrb.mxu3 %v1487_v23  ;;  %320 = vmatpush.msrb.mxu2 %v1497_v26 }
  0x39   :  { %280 = vmatpush.msrb.mxu0 %v1518_v33  ;;  %300 = vmatpush.msrb.mxu1 %v1516_v32 }
  0x3a   :  { %340 = vmatpush.msrb.mxu3 %v1499_v27  ;;  %321 = vmatpush.msrb.mxu2 %v1509_v30 }
  0x3b   :  { %281 = vmatpush.msrb.mxu0 %v1530_v37  ;;  %301 = vmatpush.msrb.mxu1 %v1528_v36 }
  0x3c   :  { %341 = vmatpush.msrb.mxu3 %v1511_v31  ;;  %322 = vmatpush.msrb.mxu2 %v1521_v34 }
  0x3d   :  { %282 = vmatpush.msrb.mxu0 %v1542_v41  ;;  %302 = vmatpush.msrb.mxu1 %v1540_v40 }
  0x3e   :  { %342 = vmatpush.msrb.mxu3 %v1523_v35  ;;  %323 = vmatpush.msrb.mxu2 %v1533_v38 }
  0x3f   :  { %283 = vmatpush.msrb.mxu0 %v1554_v45  ;;  %303 = vmatpush.msrb.mxu1 %v1552_v44 }
  0x40   :  { %343 = vmatpush.msrb.mxu3 %v1535_v39  ;;  %324 = vmatpush.msrb.mxu2 %v1545_v42 }
  0x41   :  { %284 = vmatpush.msrb.mxu0 %v1566_v49  ;;  %304 = vmatpush.msrb.mxu1 %v1564_v48 }
  0x42   :  { %344 = vmatpush.msrb.mxu3 %v1547_v43  ;;  %325 = vmatpush.msrb.mxu2 %v1557_v46 }
  0x43   :  { %285 = vmatpush.msrb.mxu0 %v1578_v53  ;;  %305 = vmatpush.msrb.mxu1 %v1576_v52 }
  0x44   :  { %345 = vmatpush.msrb.mxu3 %v1559_v47  ;;  %326 = vmatpush.msrb.mxu2 %v1569_v50 }
  0x45   :  { %286 = vmatpush.msrb.mxu0 %v1590_v57  ;;  %306 = vmatpush.msrb.mxu1 %v1588_v56 }
  0x46   :  { %346 = vmatpush.msrb.mxu3 %v2362_v51  ;;  %327 = vmatpush.msrb.mxu2 %v2363_v55 }
  0x47   :  { %287 = vmatpush.msrb.mxu0 %v1604_v61  ;;  %307 = vmatpush.msrb.mxu1 %v1602_v60 }
  0x48   :  { %347 = vmatpush.msrb.mxu3 %v2364_v62  ;;  %328 = vmatpush.msrb.mxu2 %v1593_v58 }
  0x49   :  { %288 = vmatpush.msrb.mxu0 %v1610_v54  ;;  %308 = vmatpush.msrb.mxu1 %v1608_v63 }
  0x4a   :  { %348 = vmatpush.msrb.mxu3 %v1595_v59  ;;  %440 = vmatpush.msra.mxu2 %v1424_v0 }
  0x4b   :  { %400 = vmatpush.msra.mxu0 %v1442_v7  ;;  %420 = vmatpush.msra.mxu1 %v1438_v6 }
  0x4c   :  { %460 = vmatpush.msra.mxu3 %v1426_v1  ;;  %441 = vmatpush.msra.mxu2 %v1428_v2 }
  0x4d   :  { %401 = vmatpush.msra.mxu0 %v1452_v11  ;;  %421 = vmatpush.msra.mxu1 %v1444_v8 }
  0x4e   :  { %461 = vmatpush.msra.mxu3 %v1432_v3  ;;  %442 = vmatpush.msra.mxu2 %v1434_v4 }
  0x4f   :  { %402 = vmatpush.msra.mxu0 %v1458_v13  ;;  %422 = vmatpush.msra.mxu1 %v1456_v12 }
  0x50   :  { %462 = vmatpush.msra.mxu3 %v1436_v5  ;;  %443 = vmatpush.msra.mxu2 %v1447_v9 }
  0x51   :  { %403 = vmatpush.msra.mxu0 %v1470_v17  ;;  %423 = vmatpush.msra.mxu1 %v1468_v16 }
  0x52   :  { %463 = vmatpush.msra.mxu3 %v1449_v10  ;;  %444 = vmatpush.msra.mxu2 %v1461_v14 }
  0x53   :  { %404 = vmatpush.msra.mxu0 %v1482_v21  ;;  %424 = vmatpush.msra.mxu1 %v1480_v20 }
  0x54   :  { %464 = vmatpush.msra.mxu3 %v1463_v15  ;;  %445 = vmatpush.msra.mxu2 %v1473_v18 }
  0x55   :  { %405 = vmatpush.msra.mxu0 %v1494_v25  ;;  %425 = vmatpush.msra.mxu1 %v1492_v24 }
  0x56   :  { %465 = vmatpush.msra.mxu3 %v1475_v19  ;;  %446 = vmatpush.msra.mxu2 %v1485_v22 }
  0x57   :  { %406 = vmatpush.msra.mxu0 %v1506_v29  ;;  %426 = vmatpush.msra.mxu1 %v1504_v28 }
  0x58   :  { %466 = vmatpush.msra.mxu3 %v1487_v23  ;;  %447 = vmatpush.msra.mxu2 %v1497_v26 }
  0x59   :  { %407 = vmatpush.msra.mxu0 %v1518_v33  ;;  %427 = vmatpush.msra.mxu1 %v1516_v32 }
  0x5a   :  { %467 = vmatpush.msra.mxu3 %v1499_v27  ;;  %448 = vmatpush.msra.mxu2 %v1509_v30 }
  0x5b   :  { %408 = vmatpush.msra.mxu0 %v1530_v37  ;;  %428 = vmatpush.msra.mxu1 %v1528_v36 }
  0x5c   :  { %468 = vmatpush.msra.mxu3 %v1511_v31  ;;  %449 = vmatpush.msra.mxu2 %v1521_v34 }
  0x5d   :  { %409 = vmatpush.msra.mxu0 %v1542_v41  ;;  %429 = vmatpush.msra.mxu1 %v1540_v40 }
  0x5e   :  { %469 = vmatpush.msra.mxu3 %v1523_v35  ;;  %450 = vmatpush.msra.mxu2 %v1533_v38 }
  0x5f   :  { %410 = vmatpush.msra.mxu0 %v1554_v45  ;;  %430 = vmatpush.msra.mxu1 %v1552_v44 }
  0x60   :  { %470 = vmatpush.msra.mxu3 %v1535_v39  ;;  %451 = vmatpush.msra.mxu2 %v1545_v42 }
  0x61   :  { %411 = vmatpush.msra.mxu0 %v1566_v49  ;;  %431 = vmatpush.msra.mxu1 %v1564_v48 }
  0x62   :  { %471 = vmatpush.msra.mxu3 %v1547_v43  ;;  %452 = vmatpush.msra.mxu2 %v1557_v46 }
  0x63   :  { %412 = vmatpush.msra.mxu0 %v1578_v53  ;;  %432 = vmatpush.msra.mxu1 %v1576_v52 }
  0x64   :  { %472 = vmatpush.msra.mxu3 %v1559_v47  ;;  %453 = vmatpush.msra.mxu2 %v1569_v50 }
  0x65   :  { %413 = vmatpush.msra.mxu0 %v1590_v57  ;;  %433 = vmatpush.msra.mxu1 %v1588_v56 }
  0x66   :  { %473 = vmatpush.msra.mxu3 %v2362_v51  ;;  %454 = vmatpush.msra.mxu2 %v2363_v55  ;;  %v41_v51 = vld [vmem:[%s2256_s1] sm:$0xf] }
  0x67   :  { %414 = vmatpush.msra.mxu0 %v1604_v61  ;;  %434 = vmatpush.msra.mxu1 %v1602_v60  ;;  %v60_v60 = vld [vmem:[%s2257_s2] sm:$0xf]  ;;  %v48_v61 = vperm.slane %v41_v51, 0  ;;  %v49_v55 = vperm.slane %v41_v51, 1  ;;  %v50_v50 = vperm.slane %v41_v51, 2 }
  0x68   :  { %474 = vmatpush.msra.mxu3 %v2364_v62  ;;  %455 = vmatpush.msra.mxu2 %v1593_v58  ;;  %v51_v62 = vperm.slane %v41_v51, 3  ;;  %v62_v56 = vperm.slane %v60_v60, 0  ;;  %v64_v57 = vperm.slane %v60_v60, 2 }
  0x69   :  { %415 = vmatpush.msra.mxu0 %v1610_v54  ;;  %435 = vmatpush.msra.mxu1 %v1608_v63  ;;  %v63_v54 = vperm.slane %v60_v60, 1  ;;  %v65_v63 = vperm.slane %v60_v60, 3 }
  0x6a   :  { %475 = vmatpush.msra.mxu3 %v1595_v59 }
  0x9c   :  { %v45_v47 = vpop.permute.xlu0 %44 }
  0x9d   :  { %v56_v58 = vmul.f32 %v48_v61, %v45_v47  ;;  %v57_v46 = vmul.f32 %v49_v55, %v45_v47  ;;  %v58_v59 = vmul.f32 %v50_v50, %v45_v47  ;;  %v59_v52 = vmul.f32 %v51_v62, %v45_v47 }
  0x9f   :  { %v70_v53 = vadd.f32 %v62_v56, %v56_v58  ;;  %v71_v43 = vadd.f32 %v63_v54, %v57_v46  ;;  %v72_v42 = vadd.f32 %v64_v57, %v58_v59  ;;  %v73_v48 = vadd.f32 %v65_v63, %v59_v52 }
  0xa1   :  { %74 = vst [vmem:[#allocation2] sm:$0xff] %v70_v53 }
  0xa2   :  { %75 = vst [vmem:[#allocation2 + $0x8] sm:$0xff] %v71_v43 }
  0xa3   :  { %76 = vst [vmem:[#allocation2 + $0x10] sm:$0xff] %v72_v42 }
  0xa4   :  { %77 = vst [vmem:[#allocation2 + $0x18] sm:$0xff] %v73_v48 }
  0xa6   :  { %v180_v49 = vpop.f32.mrf.mxu1 }
  0xa7   :  { %v160_v39 = vpop.f32.mrf.mxu0  ;;  %v227_v51 = vrot.slane %v180_v49, 7 }
  0xa9   :  { %v200_v38 = vpop.f32.mrf.mxu2  ;;  %v220_v44 = vpop.f32.mrf.mxu3  ;;  %v231_v50 = vsel %vm230_vm0, %v160_v39, %v227_v51 }
  0xaa   :  { %v228_v60 = vrot.slane %v200_v38, 6  ;;  %v229_v61 = vrot.slane %v220_v44, 5 }
  0xab   :  { %v142_v47 = vld [vmem:[#allocation2] ss:$8 sm:$0xf] }
  0xac   :  { %v233_v46 = vsel %vm232_vm1, %v228_v60, %v229_v61 }
  0xad   :  { %v235_v52 = vsel %vm234_vm2, %v231_v50, %v233_v46 }
  0xae   :  { %v237_v43 = vadd.f32 %v235_v52, %v142_v47 }
  0xb0   :  { %v1185_v42 = vmul.f32 -1.442695, %v237_v43  ;;  %v258_v56 = vrot.slane %v237_v43, 3  ;;  %v2365_v43 = vld [vmem:[#allocation13_spill] sm:$0xff] }
  0xb2   :  { %1200 = vpow2.f32 %v1185_v42  ;;  %v2366_v42 = vld [vmem:[#allocation9_spill] sm:$0xff] }
  0xb8   :  { %v1201_v48 = vpop.eup %1200 }
  0xb9   :  { %v241_v53 = vadd.f32 1.0, %v1201_v48  ;;  %v2367_v48 = vld [vmem:[#allocation10_spill] sm:$0xff] }
  0xbb   :  { %1202 = vrcp.f32 %v241_v53  ;;  %v253_v38 = vand.u32 2147483648, %v241_v53  ;;  %v251_v39 = vand.u32 2147483647, %v241_v53  ;;  %vm247_vm4 = vweird.f32 %v241_v53 }
  0xbc   :  { %1204 = vtanh.f32 %v258_v56  ;;  %v2371_v56 = vld [vmem:[#allocation12_spill] sm:$0xff] }
  0xbd   :  { %v254_v59 = vor.u32 1.1754944e-38, %v253_v38  ;;  %vm252_vm6 = vcmp.eq.f32.partialorder %v251_v39, 8.507059e+37  ;;  %v2373_v38 = vld [vmem:[#allocation20_spill] sm:$0xff]  ;;  %v2375_v39 = vld [vmem:[#allocation15_spill] sm:$0xff] }
  0xc1   :  { %v1203_v49 = vpop.eup %1202 }
  0xc2   :  { %v243_v54 = vmul.f32 %v1203_v49, %v241_v53  ;;  %vm248_vm3 = vweird.f32 %v1203_v49  ;;  %v1205_v51 = vpop.eup %1204  ;;  %v2368_v53 = vld [vmem:[#allocation17_spill] sm:$0xff] }
  0xc3   :  { %vm249_vm5 = vmor %vm247_vm4, %vm248_vm3 }
  0xc4   :  { %v244_v57 = vsub.f32 1.0, %v243_v54  ;;  %v2370_v54 = vld [vmem:[#allocation11_spill] sm:$0xff] }
  0xc6   :  { %v245_v44 = vmul.f32 %v1203_v49, %v244_v57  ;;  %v2372_v57 = vld [vmem:[#allocation21_spill] sm:$0xff] }
  0xc8   :  { %v246_v58 = vadd.f32 %v1203_v49, %v245_v44  ;;  %v2374_v44 = vld [vmem:[#allocation14_spill] sm:$0xff] }
  0xca   :  { %v250_v63 = vsel %vm249_vm5, %v1203_v49, %v246_v58  ;;  %v2369_v49 = vld [vmem:[#allocation16_spill] sm:$0xff]  ;;  %v2376_v58 = vld [vmem:[#allocation25_spill] sm:$0xff] }
  0xcb   :  { %v255_v55 = vsel %vm252_vm6, %v254_v59, %v250_v63  ;;  %v2377_v59 = vld [vmem:[#allocation24_spill] sm:$0xff]  ;;  %v2378_v63 = vld [vmem:[#allocation18_spill] sm:$0xff] }
  0xcc   :  { %v262_v62 = vrot.slane %v255_v55, 1  ;;  %v265_v61 = vmul.f32 %v1205_v51, %v255_v55  ;;  %v268_v46 = vrot.slane %v255_v55, 2  ;;  %v2379_v55 = vld [vmem:[#allocation19_spill] sm:$0xff]  ;;  %v2381_v51 = vld [vmem:[#allocation28_spill] sm:$0xff] }
  0xce   :  { %v264_v60 = vmul.f32 0.0, %v262_v62  ;;  %v2380_v62 = vld [vmem:[#allocation29_spill] sm:$0xff] }
  0xd0   :  { %v1756_v50 = vadd.f32 %v265_v61, %v264_v60  ;;  %v2382_v60 = vld [vmem:[#allocation22_spill] sm:$0xff]  ;;  %v2383_v61 = vld [vmem:[#allocation23_spill] sm:$0xff] }
  0xd2   :  { %1206 = vtanh.f32 %v1756_v50 }
  0xd8   :  { %v1207_v47 = vpop.eup %1206 }
  0xd9   :  { %v270_v52 = vmul.f32 %v1207_v47, %v268_v46  ;;  %v2384_v46 = vld [vmem:[#allocation31_spill] sm:$0xff]  ;;  %v2385_v47 = vld [vmem:[#allocation30_spill] sm:$0xff] }
  0xdb   :  { %289 = vmatmul.f32.vlgmr.msrb.gmra.mxu0 %v270_v52  ;;  %309 = vmatmul.f32.vlgmr.msrb.gmra.mxu1 %v270_v52 }
  0xdc   :  { %329 = vmatmul.f32.vlgmr.msrb.gmra.mxu2 %v270_v52  ;;  %349 = vmatmul.f32.vlgmr.msrb.gmra.mxu3 %v270_v52  ;;  %v2386_v52 = vld [vmem:[#allocation26_spill] sm:$0xff] }
  0xdd   :  { %527 = vmatpush.msrb.mxu0 %v1442_v7  ;;  %547 = vmatpush.msrb.mxu1 %v1438_v6 }
  0xde   :  { %567 = vmatpush.msrb.mxu2 %v1424_v0  ;;  %587 = vmatpush.msrb.mxu3 %v1426_v1 }
  0xdf   :  { %528 = vmatpush.msrb.mxu0 %v1452_v11  ;;  %548 = vmatpush.msrb.mxu1 %v1444_v8 }
  0xe0   :  { %568 = vmatpush.msrb.mxu2 %v1428_v2  ;;  %588 = vmatpush.msrb.mxu3 %v1432_v3 }
  0xe1   :  { %529 = vmatpush.msrb.mxu0 %v1458_v13  ;;  %549 = vmatpush.msrb.mxu1 %v1456_v12 }
  0xe2   :  { %569 = vmatpush.msrb.mxu2 %v1434_v4  ;;  %589 = vmatpush.msrb.mxu3 %v1436_v5 }
  0xe3   :  { %530 = vmatpush.msrb.mxu0 %v1470_v17  ;;  %550 = vmatpush.msrb.mxu1 %v1468_v16 }
  0xe4   :  { %570 = vmatpush.msrb.mxu2 %v1447_v9  ;;  %590 = vmatpush.msrb.mxu3 %v1449_v10 }
  0xe5   :  { %531 = vmatpush.msrb.mxu0 %v1482_v21  ;;  %551 = vmatpush.msrb.mxu1 %v1480_v20 }
  0xe6   :  { %571 = vmatpush.msrb.mxu2 %v1461_v14  ;;  %591 = vmatpush.msrb.mxu3 %v1463_v15 }
  0xe7   :  { %532 = vmatpush.msrb.mxu0 %v1494_v25  ;;  %552 = vmatpush.msrb.mxu1 %v1492_v24 }
  0xe8   :  { %572 = vmatpush.msrb.mxu2 %v1473_v18  ;;  %592 = vmatpush.msrb.mxu3 %v1475_v19 }
  0xe9   :  { %533 = vmatpush.msrb.mxu0 %v1506_v29  ;;  %553 = vmatpush.msrb.mxu1 %v1504_v28 }
  0xea   :  { %573 = vmatpush.msrb.mxu2 %v1485_v22  ;;  %593 = vmatpush.msrb.mxu3 %v1487_v23 }
  0xeb   :  { %534 = vmatpush.msrb.mxu0 %v1518_v33  ;;  %554 = vmatpush.msrb.mxu1 %v1516_v32 }
  0xec   :  { %574 = vmatpush.msrb.mxu2 %v1497_v26  ;;  %594 = vmatpush.msrb.mxu3 %v1499_v27 }
  0xed   :  { %535 = vmatpush.msrb.mxu0 %v1530_v37  ;;  %555 = vmatpush.msrb.mxu1 %v1528_v36 }
  0xee   :  { %575 = vmatpush.msrb.mxu2 %v1509_v30  ;;  %595 = vmatpush.msrb.mxu3 %v1511_v31 }
  0xef   :  { %536 = vmatpush.msrb.mxu0 %v1542_v41  ;;  %556 = vmatpush.msrb.mxu1 %v1540_v40 }
  0xf0   :  { %576 = vmatpush.msrb.mxu2 %v1521_v34  ;;  %596 = vmatpush.msrb.mxu3 %v1523_v35 }
  0xf1   :  { %537 = vmatpush.msrb.mxu0 %v1554_v45  ;;  %557 = vmatpush.msrb.mxu1 %v2365_v43 }
  0xf2   :  { %577 = vmatpush.msrb.mxu2 %v2366_v42  ;;  %597 = vmatpush.msrb.mxu3 %v2367_v48 }
  0xf3   :  { %538 = vmatpush.msrb.mxu0 %v2368_v53  ;;  %558 = vmatpush.msrb.mxu1 %v2369_v49 }
  0xf4   :  { %578 = vmatpush.msrb.mxu2 %v2370_v54  ;;  %598 = vmatpush.msrb.mxu3 %v2371_v56 }
  0xf5   :  { %539 = vmatpush.msrb.mxu0 %v2372_v57  ;;  %559 = vmatpush.msrb.mxu1 %v2373_v38 }
  0xf6   :  { %579 = vmatpush.msrb.mxu2 %v2374_v44  ;;  %599 = vmatpush.msrb.mxu3 %v2375_v39 }
  0xf7   :  { %540 = vmatpush.msrb.mxu0 %v2376_v58  ;;  %560 = vmatpush.msrb.mxu1 %v2377_v59  ;;  %v2387_v58 = vld [vmem:[#allocation27_spill] sm:$0xff] }
  0xf8   :  { %580 = vmatpush.msrb.mxu2 %v2378_v63  ;;  %600 = vmatpush.msrb.mxu3 %v2379_v55 }
  0xf9   :  { %541 = vmatpush.msrb.mxu0 %v2380_v62  ;;  %561 = vmatpush.msrb.mxu1 %v2381_v51 }
  0xfa   :  { %581 = vmatpush.msrb.mxu2 %v2382_v60  ;;  %601 = vmatpush.msrb.mxu3 %v2383_v61  ;;  %v272_v61 = vld [vmem:[#allocation2 + $0x1] ss:$8 sm:$0xf] }
  0xfb   :  { %542 = vmatpush.msrb.mxu0 %v2384_v46  ;;  %562 = vmatpush.msrb.mxu1 %v2385_v47 }
  0xfc   :  { %582 = vmatpush.msrb.mxu2 %v2386_v52  ;;  %602 = vmatpush.msrb.mxu3 %v2387_v58 }
 0x158   :  { %v310_v59 = vpop.f32.mrf.mxu1  ;;  %v290_v38 = vpop.f32.mrf.mxu0 }
 0x159   :  { %v357_v63 = vrot.slane %v310_v59, 7 }
 0x15b   :  { %v360_v51 = vsel %vm230_vm0, %v290_v38, %v357_v63 }
 0x15f   :  { %v330_v39 = vpop.f32.mrf.mxu2  ;;  %v350_v55 = vpop.f32.mrf.mxu3 }
 0x160   :  { %v358_v44 = vrot.slane %v330_v39, 6  ;;  %v359_v62 = vrot.slane %v350_v55, 5 }
 0x162   :  { %v361_v60 = vsel %vm232_vm1, %v358_v44, %v359_v62 }
 0x163   :  { %v362_v46 = vsel %vm234_vm2, %v360_v51, %v361_v60 }
 0x164   :  { %v364_v57 = vadd.f32 %v362_v46, %v272_v61 }
 0x166   :  { %v1186_v47 = vmul.f32 -1.442695, %v364_v57  ;;  %v385_v54 = vrot.slane %v364_v57, 3 }
 0x168   :  { %1208 = vpow2.f32 %v1186_v47 }
 0x16e   :  { %v1209_v52 = vpop.eup %1208 }
 0x16f   :  { %v368_v56 = vadd.f32 1.0, %v1209_v52 }
 0x171   :  { %1210 = vrcp.f32 %v368_v56  ;;  %v380_v39 = vand.u32 2147483648, %v368_v56  ;;  %v378_v53 = vand.u32 2147483647, %v368_v56  ;;  %vm374_vm8 = vweird.f32 %v368_v56 }
 0x172   :  { %1212 = vtanh.f32 %v385_v54 }
 0x173   :  { %v381_v44 = vor.u32 1.1754944e-38, %v380_v39  ;;  %vm379_vm10 = vcmp.eq.f32.partialorder %v378_v53, 8.507059e+37 }
 0x177   :  { %v1211_v58 = vpop.eup %1210 }
 0x178   :  { %v370_v59 = vmul.f32 %v1211_v58, %v368_v56  ;;  %vm375_vm7 = vweird.f32 %v1211_v58  ;;  %v1213_v60 = vpop.eup %1212 }
 0x179   :  { %vm376_vm9 = vmor %vm374_vm8, %vm375_vm7 }
 0x17a   :  { %v371_v49 = vsub.f32 1.0, %v370_v59 }
 0x17c   :  { %v372_v55 = vmul.f32 %v1211_v58, %v371_v49 }
 0x17e   :  { %v373_v38 = vadd.f32 %v1211_v58, %v372_v55 }
 0x180   :  { %v377_v63 = vsel %vm376_vm9, %v1211_v58, %v373_v38 }
 0x181   :  { %v382_v62 = vsel %vm379_vm10, %v381_v44, %v377_v63  ;;  %v1901_v63 = vld [vmem:[#allocation3 + $0x1e0] sm:$0xff] }
 0x182   :  { %v389_v51 = vrot.slane %v382_v62, 1  ;;  %v392_v46 = vmul.f32 %v1213_v60, %v382_v62  ;;  %v395_v49 = vrot.slane %v382_v62, 2  ;;  %v1904_v62 = vld [vmem:[#allocation3 + $0x1e8] sm:$0xff]  ;;  %v1910_v60 = vld [vmem:[#allocation3 + $0x1f8] sm:$0xff] }
 0x184   :  { %v391_v61 = vmul.f32 %v389_v51, %v1756_v50  ;;  %v1907_v51 = vld [vmem:[#allocation3 + $0x1f0] sm:$0xff] }
 0x186   :  { %v1827_v47 = vadd.f32 %v392_v46, %v391_v61  ;;  %v1913_v61 = vld [vmem:[#allocation3 + $0x1c0] sm:$0xff]  ;;  %v1916_v46 = vld [vmem:[#allocation3 + $0x1c8] sm:$0xff] }
 0x188   :  { %1214 = vtanh.f32 %v1827_v47 }
 0x18e   :  { %v1215_v57 = vpop.eup %1214 }
 0x18f   :  { %v397_v52 = vmul.f32 %v1215_v57, %v395_v49  ;;  %v1922_v49 = vld [vmem:[#allocation3 + $0x1d8] sm:$0xff]  ;;  %v1925_v57 = vld [vmem:[#allocation3 + $0x1a0] sm:$0xff] }
 0x191   :  { %416 = vmatmul.f32.vlgmr.msra.gmra.mxu0 %v397_v52  ;;  %436 = vmatmul.f32.vlgmr.msra.gmra.mxu1 %v397_v52 }
 0x192   :  { %456 = vmatmul.f32.vlgmr.msra.gmra.mxu2 %v397_v52  ;;  %476 = vmatmul.f32.vlgmr.msra.gmra.mxu3 %v397_v52  ;;  %v1928_v52 = vld [vmem:[#allocation3 + $0x1a8] sm:$0xff] }
 0x193   :  { %654 = vmatpush.msra.mxu0 %v1442_v7  ;;  %674 = vmatpush.msra.mxu1 %v1438_v6  ;;  %v2394_v6 = vld [vmem:[#allocation14_spill] sm:$0xff]  ;;  %v2395_v7 = vld [vmem:[#allocation15_spill] sm:$0xff] }
 0x194   :  { %694 = vmatpush.msra.mxu2 %v1424_v0  ;;  %714 = vmatpush.msra.mxu3 %v1426_v1  ;;  %v2388_v0 = vld [vmem:[#allocation17_spill] sm:$0xff]  ;;  %v2389_v1 = vld [vmem:[#allocation16_spill] sm:$0xff] }
 0x195   :  { %655 = vmatpush.msra.mxu0 %v1452_v11  ;;  %675 = vmatpush.msra.mxu1 %v1444_v8  ;;  %v2396_v8 = vld [vmem:[#allocation25_spill] sm:$0xff]  ;;  %v2399_v11 = vld [vmem:[#allocation19_spill] sm:$0xff] }
 0x196   :  { %695 = vmatpush.msra.mxu2 %v1428_v2  ;;  %715 = vmatpush.msra.mxu3 %v1432_v3  ;;  %v2390_v2 = vld [vmem:[#allocation11_spill] sm:$0xff]  ;;  %v2391_v3 = vld [vmem:[#allocation12_spill] sm:$0xff] }
 0x197   :  { %656 = vmatpush.msra.mxu0 %v1458_v13  ;;  %676 = vmatpush.msra.mxu1 %v1456_v12  ;;  %v2400_v12 = vld [vmem:[#allocation29_spill] sm:$0xff]  ;;  %v2401_v13 = vld [vmem:[#allocation28_spill] sm:$0xff] }
 0x198   :  { %696 = vmatpush.msra.mxu2 %v1434_v4  ;;  %716 = vmatpush.msra.mxu3 %v1436_v5  ;;  %v2392_v4 = vld [vmem:[#allocation21_spill] sm:$0xff]  ;;  %v2393_v5 = vld [vmem:[#allocation20_spill] sm:$0xff] }
 0x199   :  { %657 = vmatpush.msra.mxu0 %v1470_v17  ;;  %677 = vmatpush.msra.mxu1 %v1468_v16  ;;  %v2404_v16 = vld [vmem:[#allocation31_spill] sm:$0xff]  ;;  %v2405_v17 = vld [vmem:[#allocation30_spill] sm:$0xff] }
 0x19a   :  { %697 = vmatpush.msra.mxu2 %v1447_v9  ;;  %717 = vmatpush.msra.mxu3 %v1449_v10  ;;  %v2397_v9 = vld [vmem:[#allocation24_spill] sm:$0xff]  ;;  %v2398_v10 = vld [vmem:[#allocation18_spill] sm:$0xff] }
 0x19b   :  { %658 = vmatpush.msra.mxu0 %v1482_v21  ;;  %678 = vmatpush.msra.mxu1 %v1480_v20 }
 0x19c   :  { %698 = vmatpush.msra.mxu2 %v1461_v14  ;;  %718 = vmatpush.msra.mxu3 %v1463_v15  ;;  %v2402_v14 = vld [vmem:[#allocation22_spill] sm:$0xff]  ;;  %v2403_v15 = vld [vmem:[#allocation23_spill] sm:$0xff] }
 0x19d   :  { %659 = vmatpush.msra.mxu0 %v1494_v25  ;;  %679 = vmatpush.msra.mxu1 %v1492_v24 }
 0x19e   :  { %699 = vmatpush.msra.mxu2 %v1473_v18  ;;  %719 = vmatpush.msra.mxu3 %v1475_v19  ;;  %v2406_v18 = vld [vmem:[#allocation26_spill] sm:$0xff]  ;;  %v2407_v19 = vld [vmem:[#allocation27_spill] sm:$0xff] }
 0x19f   :  { %660 = vmatpush.msra.mxu0 %v1506_v29  ;;  %680 = vmatpush.msra.mxu1 %v1504_v28  ;;  %v399_v29 = vld [vmem:[#allocation2 + $0x2] ss:$8 sm:$0xf] }
 0x1a0   :  { %700 = vmatpush.msra.mxu2 %v1485_v22  ;;  %720 = vmatpush.msra.mxu3 %v1487_v23 }
 0x1a1   :  { %661 = vmatpush.msra.mxu0 %v1518_v33  ;;  %681 = vmatpush.msra.mxu1 %v1516_v32 }
 0x1a2   :  { %701 = vmatpush.msra.mxu2 %v1497_v26  ;;  %721 = vmatpush.msra.mxu3 %v1499_v27 }
 0x1a3   :  { %662 = vmatpush.msra.mxu0 %v1530_v37  ;;  %682 = vmatpush.msra.mxu1 %v1528_v36 }
 0x1a4   :  { %702 = vmatpush.msra.mxu2 %v1509_v30  ;;  %722 = vmatpush.msra.mxu3 %v1511_v31 }
 0x1a5   :  { %663 = vmatpush.msra.mxu0 %v1542_v41  ;;  %683 = vmatpush.msra.mxu1 %v1540_v40 }
 0x1a6   :  { %703 = vmatpush.msra.mxu2 %v1521_v34  ;;  %723 = vmatpush.msra.mxu3 %v1523_v35 }
 0x1a7   :  { %664 = vmatpush.msra.mxu0 %v1554_v45  ;;  %684 = vmatpush.msra.mxu1 %v2365_v43 }
 0x1a8   :  { %704 = vmatpush.msra.mxu2 %v2366_v42  ;;  %724 = vmatpush.msra.mxu3 %v2367_v48 }
 0x1a9   :  { %665 = vmatpush.msra.mxu0 %v2388_v0  ;;  %685 = vmatpush.msra.mxu1 %v2389_v1 }
 0x1aa   :  { %705 = vmatpush.msra.mxu2 %v2390_v2  ;;  %725 = vmatpush.msra.mxu3 %v2391_v3  ;;  %v1931_v2 = vld [vmem:[#allocation3 + $0x1b0] sm:$0xff]  ;;  %v1934_v3 = vld [vmem:[#allocation3 + $0x1b8] sm:$0xff] }
 0x1ab   :  { %666 = vmatpush.msra.mxu0 %v2392_v4  ;;  %686 = vmatpush.msra.mxu1 %v2393_v5 }
 0x1ac   :  { %706 = vmatpush.msra.mxu2 %v2394_v6  ;;  %726 = vmatpush.msra.mxu3 %v2395_v7  ;;  %v1937_v6 = vld [vmem:[#allocation3 + $0x180] sm:$0xff]  ;;  %v1940_v7 = vld [vmem:[#allocation3 + $0x188] sm:$0xff] }
 0x1ad   :  { %667 = vmatpush.msra.mxu0 %v2396_v8  ;;  %687 = vmatpush.msra.mxu1 %v2397_v9 }
 0x1ae   :  { %707 = vmatpush.msra.mxu2 %v2398_v10  ;;  %727 = vmatpush.msra.mxu3 %v2399_v11  ;;  %v1943_v10 = vld [vmem:[#allocation3 + $0x190] sm:$0xff]  ;;  %v1946_v11 = vld [vmem:[#allocation3 + $0x198] sm:$0xff] }
 0x1af   :  { %668 = vmatpush.msra.mxu0 %v2400_v12  ;;  %688 = vmatpush.msra.mxu1 %v2401_v13 }
 0x1b0   :  { %708 = vmatpush.msra.mxu2 %v2402_v14  ;;  %728 = vmatpush.msra.mxu3 %v2403_v15  ;;  %v1949_v14 = vld [vmem:[#allocation3 + $0x160] sm:$0xff]  ;;  %v1952_v15 = vld [vmem:[#allocation3 + $0x168] sm:$0xff] }
 0x1b1   :  { %669 = vmatpush.msra.mxu0 %v2404_v16  ;;  %689 = vmatpush.msra.mxu1 %v2405_v17 }
 0x1b2   :  { %709 = vmatpush.msra.mxu2 %v2406_v18  ;;  %729 = vmatpush.msra.mxu3 %v2407_v19 }
 0x20e   :  { %v437_v20 = vpop.f32.mrf.mxu1  ;;  %v417_v26 = vpop.f32.mrf.mxu0 }
 0x20f   :  { %v484_v21 = vrot.slane %v437_v20, 7  ;;  %v1955_v20 = vld [vmem:[#allocation3 + $0x170] sm:$0xff] }
 0x211   :  { %v487_v27 = vsel %vm230_vm0, %v417_v26, %v484_v21  ;;  %v1958_v21 = vld [vmem:[#allocation3 + $0x178] sm:$0xff]  ;;  %v1973_v26 = vld [vmem:[#allocation3 + $0x120] sm:$0xff] }
 0x215   :  { %v457_v22 = vpop.f32.mrf.mxu2  ;;  %v477_v23 = vpop.f32.mrf.mxu3 }
 0x216   :  { %v485_v24 = vrot.slane %v457_v22, 6  ;;  %v486_v25 = vrot.slane %v477_v23, 5  ;;  %v1961_v22 = vld [vmem:[#allocation3 + $0x140] sm:$0xff]  ;;  %v1964_v23 = vld [vmem:[#allocation3 + $0x148] sm:$0xff] }
 0x218   :  { %v488_v28 = vsel %vm232_vm1, %v485_v24, %v486_v25  ;;  %v1967_v24 = vld [vmem:[#allocation3 + $0x150] sm:$0xff]  ;;  %v1970_v25 = vld [vmem:[#allocation3 + $0x158] sm:$0xff] }
 0x219   :  { %v489_v30 = vsel %vm234_vm2, %v487_v27, %v488_v28  ;;  %v1976_v27 = vld [vmem:[#allocation3 + $0x128] sm:$0xff]  ;;  %v1979_v28 = vld [vmem:[#allocation3 + $0x130] sm:$0xff] }
 0x21a   :  { %v491_v31 = vadd.f32 %v489_v30, %v399_v29  ;;  %v1982_v29 = vld [vmem:[#allocation3 + $0x138] sm:$0xff]  ;;  %v1985_v30 = vld [vmem:[#allocation3 + $0x100] sm:$0xff] }
 0x21c   :  { %v1187_v32 = vmul.f32 -1.442695, %v491_v31  ;;  %v512_v37 = vrot.slane %v491_v31, 3  ;;  %v1988_v31 = vld [vmem:[#allocation3 + $0x108] sm:$0xff] }
 0x21e   :  { %1216 = vpow2.f32 %v1187_v32  ;;  %v1991_v32 = vld [vmem:[#allocation3 + $0x110] sm:$0xff] }
 0x224   :  { %v1217_v33 = vpop.eup %1216 }
 0x225   :  { %v495_v34 = vadd.f32 1.0, %v1217_v33  ;;  %v1994_v33 = vld [vmem:[#allocation3 + $0x118] sm:$0xff] }
 0x227   :  { %1218 = vrcp.f32 %v495_v34  ;;  %v507_v41 = vand.u32 2147483648, %v495_v34  ;;  %v505_v50 = vand.u32 2147483647, %v495_v34  ;;  %vm501_vm12 = vweird.f32 %v495_v34 }
 0x228   :  { %1220 = vtanh.f32 %v512_v37  ;;  %v2006_v37 = vld [vmem:[#allocation3 + $0xf8] sm:$0xff] }
 0x229   :  { %v508_v42 = vor.u32 1.1754944e-38, %v507_v41  ;;  %vm506_vm14 = vcmp.eq.f32.partialorder %v505_v50, 8.507059e+37  ;;  %v2012_v41 = vld [vmem:[#allocation3 + $0xc8] sm:$0xff]  ;;  %v2018_v50 = vld [vmem:[#allocation3 + $0xd8] sm:$0xff] }
 0x22d   :  { %v1219_v35 = vpop.eup %1218 }
 0x22e   :  { %v497_v36 = vmul.f32 %v1219_v35, %v495_v34  ;;  %vm502_vm11 = vweird.f32 %v1219_v35  ;;  %v1221_v56 = vpop.eup %1220  ;;  %v1997_v34 = vld [vmem:[#allocation3 + $0xe0] sm:$0xff] }
 0x22f   :  { %vm503_vm13 = vmor %vm501_vm12, %vm502_vm11 }
 0x230   :  { %v498_v40 = vsub.f32 1.0, %v497_v36  ;;  %v2003_v36 = vld [vmem:[#allocation3 + $0xf0] sm:$0xff] }
 0x232   :  { %v499_v45 = vmul.f32 %v1219_v35, %v498_v40  ;;  %v2009_v40 = vld [vmem:[#allocation3 + $0xc0] sm:$0xff] }
 0x234   :  { %v500_v43 = vadd.f32 %v1219_v35, %v499_v45  ;;  %v2015_v45 = vld [vmem:[#allocation3 + $0xd0] sm:$0xff] }
 0x236   :  { %v504_v48 = vsel %vm503_vm13, %v1219_v35, %v500_v43  ;;  %v2000_v35 = vld [vmem:[#allocation3 + $0xe8] sm:$0xff]  ;;  %v2021_v43 = vld [vmem:[#allocation3 + $0xa0] sm:$0xff] }
 0x237   :  { %v509_v53 = vsel %vm506_vm14, %v508_v42, %v504_v48  ;;  %v2024_v42 = vld [vmem:[#allocation3 + $0xa8] sm:$0xff]  ;;  %v2027_v48 = vld [vmem:[#allocation3 + $0xb0] sm:$0xff] }
 0x238   :  { %v516_v54 = vrot.slane %v509_v53, 1  ;;  %v519_v59 = vmul.f32 %v1221_v56, %v509_v53  ;;  %v522_v55 = vrot.slane %v509_v53, 2  ;;  %v2030_v53 = vld [vmem:[#allocation3 + $0xb8] sm:$0xff] }
 0x239   :  { %v2038_v56 = vld [vmem:[#allocation3 + $0x98] sm:$0xff] }
 0x23a   :  { %v518_v58 = vmul.f32 %v516_v54, %v1827_v47  ;;  %v1919_v47 = vld [vmem:[#allocation3 + $0x1d0] sm:$0xff]  ;;  %2409 = vst [vmem:[#allocation9_spill] sm:$0xff] %v2038_v56 }
 0x23b   :  { %v2035_v54 = vld [vmem:[#allocation3 + $0x90] sm:$0xff] }
 0x23c   :  { %v1898_v39 = vadd.f32 %v519_v59, %v518_v58  ;;  %2408 = vst [vmem:[#allocation13_spill] sm:$0xff] %v2035_v54  ;;  %v2043_v58 = vld [vmem:[#allocation3 + $0x70] sm:$0xff]  ;;  %v2046_v59 = vld [vmem:[#allocation3 + $0x78] sm:$0xff] }
 0x23d   :  { %2410 = vst [vmem:[#allocation10_spill] sm:$0xff] %v2043_v58 }
 0x23e   :  { %1222 = vtanh.f32 %v1898_v39  ;;  %2411 = vst [vmem:[#allocation17_spill] sm:$0xff] %v2046_v59 }
 0x244   :  { %v1223_v38 = vpop.eup %1222 }
 0x245   :  { %v524_v44 = vmul.f32 %v1223_v38, %v522_v55 }
 0x247   :  { %543 = vmatmul.f32.vlgmr.msrb.gmra.mxu0 %v524_v44  ;;  %563 = vmatmul.f32.vlgmr.msrb.gmra.mxu1 %v524_v44 }
 0x248   :  { %583 = vmatmul.f32.vlgmr.msrb.gmra.mxu2 %v524_v44  ;;  %603 = vmatmul.f32.vlgmr.msrb.gmra.mxu3 %v524_v44 }
 0x249   :  { %781 = vmatpush.msrb.mxu0 %v1901_v63  ;;  %801 = vmatpush.msrb.mxu1 %v1904_v62 }
 0x24a   :  { %821 = vmatpush.msrb.mxu2 %v1907_v51  ;;  %841 = vmatpush.msrb.mxu3 %v1910_v60 }
 0x24b   :  { %782 = vmatpush.msrb.mxu0 %v1913_v61  ;;  %802 = vmatpush.msrb.mxu1 %v1916_v46 }
 0x24c   :  { %822 = vmatpush.msrb.mxu2 %v1919_v47  ;;  %842 = vmatpush.msrb.mxu3 %v1922_v49 }
 0x24d   :  { %783 = vmatpush.msrb.mxu0 %v1925_v57  ;;  %803 = vmatpush.msrb.mxu1 %v1928_v52 }
 0x24e   :  { %823 = vmatpush.msrb.mxu2 %v1931_v2  ;;  %843 = vmatpush.msrb.mxu3 %v1934_v3 }
 0x24f   :  { %784 = vmatpush.msrb.mxu0 %v1937_v6  ;;  %804 = vmatpush.msrb.mxu1 %v1940_v7 }
 0x250   :  { %824 = vmatpush.msrb.mxu2 %v1943_v10  ;;  %844 = vmatpush.msrb.mxu3 %v1946_v11 }
 0x251   :  { %785 = vmatpush.msrb.mxu0 %v1949_v14  ;;  %805 = vmatpush.msrb.mxu1 %v1952_v15 }
 0x252   :  { %825 = vmatpush.msrb.mxu2 %v1955_v20  ;;  %845 = vmatpush.msrb.mxu3 %v1958_v21 }
 0x253   :  { %786 = vmatpush.msrb.mxu0 %v1961_v22  ;;  %806 = vmatpush.msrb.mxu1 %v1964_v23 }
 0x254   :  { %826 = vmatpush.msrb.mxu2 %v1967_v24  ;;  %846 = vmatpush.msrb.mxu3 %v1970_v25 }
 0x255   :  { %787 = vmatpush.msrb.mxu0 %v1973_v26  ;;  %807 = vmatpush.msrb.mxu1 %v1976_v27 }
 0x256   :  { %827 = vmatpush.msrb.mxu2 %v1979_v28  ;;  %847 = vmatpush.msrb.mxu3 %v1982_v29 }
 0x257   :  { %788 = vmatpush.msrb.mxu0 %v1985_v30  ;;  %808 = vmatpush.msrb.mxu1 %v1988_v31 }
 0x258   :  { %828 = vmatpush.msrb.mxu2 %v1991_v32  ;;  %848 = vmatpush.msrb.mxu3 %v1994_v33 }
 0x259   :  { %789 = vmatpush.msrb.mxu0 %v1997_v34  ;;  %809 = vmatpush.msrb.mxu1 %v2000_v35 }
 0x25a   :  { %829 = vmatpush.msrb.mxu2 %v2003_v36  ;;  %849 = vmatpush.msrb.mxu3 %v2006_v37 }
 0x25b   :  { %790 = vmatpush.msrb.mxu0 %v2009_v40  ;;  %810 = vmatpush.msrb.mxu1 %v2012_v41 }
 0x25c   :  { %830 = vmatpush.msrb.mxu2 %v2015_v45  ;;  %850 = vmatpush.msrb.mxu3 %v2018_v50 }
 0x25d   :  { %791 = vmatpush.msrb.mxu0 %v2021_v43  ;;  %811 = vmatpush.msrb.mxu1 %v2024_v42 }
 0x25e   :  { %831 = vmatpush.msrb.mxu2 %v2027_v48  ;;  %851 = vmatpush.msrb.mxu3 %v2030_v53 }
 0x25f   :  { %792 = vmatpush.msrb.mxu0 %v2388_v0  ;;  %812 = vmatpush.msrb.mxu1 %v2389_v1  ;;  %v2051_v0 = vld [vmem:[#allocation3 + $0x50] sm:$0xff]  ;;  %v2054_v1 = vld [vmem:[#allocation3 + $0x58] sm:$0xff] }
 0x260   :  { %832 = vmatpush.msrb.mxu2 %v2035_v54  ;;  %852 = vmatpush.msrb.mxu3 %v2038_v56  ;;  %2412 = vst [vmem:[#allocation16_spill] sm:$0xff] %v2051_v0 }
 0x261   :  { %793 = vmatpush.msrb.mxu0 %v2392_v4  ;;  %813 = vmatpush.msrb.mxu1 %v2393_v5  ;;  %2413 = vst [vmem:[#allocation11_spill] sm:$0xff] %v2054_v1  ;;  %v2059_v4 = vld [vmem:[#allocation3 + $0x30] sm:$0xff]  ;;  %v2062_v5 = vld [vmem:[#allocation3 + $0x38] sm:$0xff] }
 0x262   :  { %833 = vmatpush.msrb.mxu2 %v2043_v58  ;;  %853 = vmatpush.msrb.mxu3 %v2046_v59  ;;  %2414 = vst [vmem:[#allocation12_spill] sm:$0xff] %v2059_v4 }
 0x263   :  { %794 = vmatpush.msrb.mxu0 %v2396_v8  ;;  %814 = vmatpush.msrb.mxu1 %v2397_v9  ;;  %2415 = vst [vmem:[#allocation21_spill] sm:$0xff] %v2062_v5 }
 0x264   :  { %834 = vmatpush.msrb.mxu2 %v2051_v0  ;;  %854 = vmatpush.msrb.mxu3 %v2054_v1 }
 0x265   :  { %795 = vmatpush.msrb.mxu0 %v2400_v12  ;;  %815 = vmatpush.msrb.mxu1 %v2401_v13 }
 0x266   :  { %835 = vmatpush.msrb.mxu2 %v2059_v4  ;;  %855 = vmatpush.msrb.mxu3 %v2062_v5  ;;  %v526_v5 = vld [vmem:[#allocation2 + $0x3] ss:$8 sm:$0xf] }
 0x267   :  { %796 = vmatpush.msrb.mxu0 %v2404_v16  ;;  %816 = vmatpush.msrb.mxu1 %v2405_v17 }
 0x268   :  { %836 = vmatpush.msrb.mxu2 %v2406_v18  ;;  %856 = vmatpush.msrb.mxu3 %v2407_v19 }
 0x2c4   :  { %v564_v8 = vpop.f32.mrf.mxu1  ;;  %v544_v44 = vpop.f32.mrf.mxu0 }
 0x2c5   :  { %v611_v9 = vrot.slane %v564_v8, 7 }
 0x2c7   :  { %v614_v4 = vsel %vm230_vm0, %v544_v44, %v611_v9 }
 0x2cb   :  { %v584_v12 = vpop.f32.mrf.mxu2  ;;  %v604_v13 = vpop.f32.mrf.mxu3 }
 0x2cc   :  { %v612_v55 = vrot.slane %v584_v12, 6  ;;  %v613_v38 = vrot.slane %v604_v13, 5 }
 0x2ce   :  { %v615_v1 = vsel %vm232_vm1, %v612_v55, %v613_v38 }
 0x2cf   :  { %v616_v16 = vsel %vm234_vm2, %v614_v4, %v615_v1 }
 0x2d0   :  { %v618_v0 = vadd.f32 %v616_v16, %v526_v5 }
 0x2d2   :  { %v1188_v17 = vmul.f32 -1.442695, %v618_v0  ;;  %v639_v58 = vrot.slane %v618_v0, 3 }
 0x2d4   :  { %1224 = vpow2.f32 %v1188_v17 }
 0x2da   :  { %v1225_v18 = vpop.eup %1224 }
 0x2db   :  { %v622_v59 = vadd.f32 1.0, %v1225_v18 }
 0x2dd   :  { %1226 = vrcp.f32 %v622_v59  ;;  %v634_v12 = vand.u32 2147483648, %v622_v59  ;;  %v632_v54 = vand.u32 2147483647, %v622_v59  ;;  %vm628_vm3 = vweird.f32 %v622_v59 }
 0x2de   :  { %1228 = vtanh.f32 %v639_v58  ;;  %v2418_v58 = vld [vmem:[#allocation13_spill] sm:$0xff] }
 0x2df   :  { %v635_v55 = vor.u32 1.1754944e-38, %v634_v12  ;;  %vm633_vm5 = vcmp.eq.f32.partialorder %v632_v54, 8.507059e+37  ;;  %v2123_v54 = vld [vmem:[#allocation3 + $0x88] sm:$0xff] }
 0x2e0   :  { %2417 = vst [vmem:[#allocation14_spill] sm:$0xff] %v2123_v54  ;;  %v2422_v12 = vld [vmem:[#allocation10_spill] sm:$0xff] }
 0x2e3   :  { %v1227_v19 = vpop.eup %1226 }
 0x2e4   :  { %v624_v8 = vmul.f32 %v1227_v19, %v622_v59  ;;  %vm629_vm15 = vweird.f32 %v1227_v19  ;;  %v1229_v38 = vpop.eup %1228  ;;  %v2419_v59 = vld [vmem:[#allocation9_spill] sm:$0xff] }
 0x2e5   :  { %vm630_vm4 = vmor %vm628_vm3, %vm629_vm15 }
 0x2e6   :  { %v625_v56 = vsub.f32 1.0, %v624_v8  ;;  %v2131_v8 = vld [vmem:[#allocation3 + $0x68] sm:$0xff] }
 0x2e7   :  { %2421 = vst [vmem:[#allocation25_spill] sm:$0xff] %v2131_v8 }
 0x2e8   :  { %v626_v13 = vmul.f32 %v1227_v19, %v625_v56 }
 0x2ea   :  { %v627_v9 = vadd.f32 %v1227_v19, %v626_v13  ;;  %v2423_v13 = vld [vmem:[#allocation17_spill] sm:$0xff] }
 0x2ec   :  { %v631_v1 = vsel %vm630_vm4, %v1227_v19, %v627_v9  ;;  %v2128_v19 = vld [vmem:[#allocation3 + $0x60] sm:$0xff] }
 0x2ed   :  { %v636_v4 = vsel %vm633_vm5, %v635_v55, %v631_v1  ;;  %2420 = vst [vmem:[#allocation15_spill] sm:$0xff] %v2128_v19  ;;  %v2136_v9 = vld [vmem:[#allocation3 + $0x40] sm:$0xff]  ;;  %v2139_v55 = vld [vmem:[#allocation3 + $0x48] sm:$0xff] }
 0x2ee   :  { %v643_v5 = vrot.slane %v636_v4, 1  ;;  %v646_v16 = vmul.f32 %v1229_v38, %v636_v4  ;;  %v649_v56 = vrot.slane %v636_v4, 2  ;;  %2424 = vst [vmem:[#allocation24_spill] sm:$0xff] %v2136_v9  ;;  %v2426_v1 = vld [vmem:[#allocation16_spill] sm:$0xff]  ;;  %v2427_v4 = vld [vmem:[#allocation11_spill] sm:$0xff]  ;;  %v2147_v38 = vld [vmem:[#allocation3 + $0x28] sm:$0xff] }
 0x2ef   :  { %2425 = vst [vmem:[#allocation18_spill] sm:$0xff] %v2139_v55 }
 0x2f0   :  { %v645_v44 = vmul.f32 %v643_v5, %v1898_v39  ;;  %v2120_v39 = vld [vmem:[#allocation3 + $0x80] sm:$0xff]  ;;  %2429 = vst [vmem:[#allocation29_spill] sm:$0xff] %v2147_v38 }
 0x2f1   :  { %2416 = vst [vmem:[#allocation20_spill] sm:$0xff] %v2120_v39  ;;  %v2144_v5 = vld [vmem:[#allocation3 + $0x20] sm:$0xff] }
 0x2f2   :  { %v2073_v17 = vadd.f32 %v646_v16, %v645_v44  ;;  %2428 = vst [vmem:[#allocation19_spill] sm:$0xff] %v2144_v5  ;;  %v2430_v44 = vld [vmem:[#allocation12_spill] sm:$0xff]  ;;  %v2431_v16 = vld [vmem:[#allocation21_spill] sm:$0xff] }
 0x2f4   :  { %1230 = vtanh.f32 %v2073_v17 }
 0x2fa   :  { %v1231_v0 = vpop.eup %1230 }
 0x2fb   :  { %v651_v18 = vmul.f32 %v1231_v0, %v649_v56  ;;  %v2152_v56 = vld [vmem:[#allocation3] sm:$0xff]  ;;  %v2155_v0 = vld [vmem:[#allocation3 + $0x8] sm:$0xff] }
 0x2fc   :  { %2432 = vst [vmem:[#allocation28_spill] sm:$0xff] %v2152_v56 }
 0x2fd   :  { %670 = vmatmul.f32.vlgmr.msra.gmra.mxu0 %v651_v18  ;;  %690 = vmatmul.f32.vlgmr.msra.gmra.mxu1 %v651_v18  ;;  %2433 = vst [vmem:[#allocation22_spill] sm:$0xff] %v2155_v0 }
 0x2fe   :  { %710 = vmatmul.f32.vlgmr.msra.gmra.mxu2 %v651_v18  ;;  %730 = vmatmul.f32.vlgmr.msra.gmra.mxu3 %v651_v18  ;;  %v2158_v18 = vld [vmem:[#allocation3 + $0x10] sm:$0xff] }
 0x2ff   :  { %908 = vmatpush.msra.mxu0 %v1901_v63  ;;  %928 = vmatpush.msra.mxu1 %v1904_v62  ;;  %2434 = vst [vmem:[#allocation23_spill] sm:$0xff] %v2158_v18 }
 0x300   :  { %948 = vmatpush.msra.mxu2 %v1907_v51  ;;  %968 = vmatpush.msra.mxu3 %v1910_v60 }
 0x301   :  { %909 = vmatpush.msra.mxu0 %v1913_v61  ;;  %929 = vmatpush.msra.mxu1 %v1916_v46 }
 0x302   :  { %949 = vmatpush.msra.mxu2 %v1919_v47  ;;  %969 = vmatpush.msra.mxu3 %v1922_v49 }
 0x303   :  { %910 = vmatpush.msra.mxu0 %v1925_v57  ;;  %930 = vmatpush.msra.mxu1 %v1928_v52 }
 0x304   :  { %950 = vmatpush.msra.mxu2 %v1931_v2  ;;  %970 = vmatpush.msra.mxu3 %v1934_v3 }
 0x305   :  { %911 = vmatpush.msra.mxu0 %v1937_v6  ;;  %931 = vmatpush.msra.mxu1 %v1940_v7 }
 0x306   :  { %951 = vmatpush.msra.mxu2 %v1943_v10  ;;  %971 = vmatpush.msra.mxu3 %v1946_v11 }
 0x307   :  { %912 = vmatpush.msra.mxu0 %v1949_v14  ;;  %932 = vmatpush.msra.mxu1 %v1952_v15 }
 0x308   :  { %952 = vmatpush.msra.mxu2 %v1955_v20  ;;  %972 = vmatpush.msra.mxu3 %v1958_v21 }
 0x309   :  { %913 = vmatpush.msra.mxu0 %v1961_v22  ;;  %933 = vmatpush.msra.mxu1 %v1964_v23 }
 0x30a   :  { %953 = vmatpush.msra.mxu2 %v1967_v24  ;;  %973 = vmatpush.msra.mxu3 %v1970_v25 }
 0x30b   :  { %914 = vmatpush.msra.mxu0 %v1973_v26  ;;  %934 = vmatpush.msra.mxu1 %v1976_v27 }
 0x30c   :  { %954 = vmatpush.msra.mxu2 %v1979_v28  ;;  %974 = vmatpush.msra.mxu3 %v1982_v29 }
 0x30d   :  { %915 = vmatpush.msra.mxu0 %v1985_v30  ;;  %935 = vmatpush.msra.mxu1 %v1988_v31 }
 0x30e   :  { %955 = vmatpush.msra.mxu2 %v1991_v32  ;;  %975 = vmatpush.msra.mxu3 %v1994_v33 }
 0x30f   :  { %916 = vmatpush.msra.mxu0 %v1997_v34  ;;  %936 = vmatpush.msra.mxu1 %v2000_v35 }
 0x310   :  { %956 = vmatpush.msra.mxu2 %v2003_v36  ;;  %976 = vmatpush.msra.mxu3 %v2006_v37 }
 0x311   :  { %917 = vmatpush.msra.mxu0 %v2009_v40  ;;  %937 = vmatpush.msra.mxu1 %v2012_v41 }
 0x312   :  { %957 = vmatpush.msra.mxu2 %v2015_v45  ;;  %977 = vmatpush.msra.mxu3 %v2018_v50 }
 0x313   :  { %918 = vmatpush.msra.mxu0 %v2021_v43  ;;  %938 = vmatpush.msra.mxu1 %v2024_v42 }
 0x314   :  { %958 = vmatpush.msra.mxu2 %v2027_v48  ;;  %978 = vmatpush.msra.mxu3 %v2030_v53 }
 0x315   :  { %919 = vmatpush.msra.mxu0 %v2120_v39  ;;  %939 = vmatpush.msra.mxu1 %v2123_v54 }
 0x316   :  { %959 = vmatpush.msra.mxu2 %v2418_v58  ;;  %979 = vmatpush.msra.mxu3 %v2419_v59 }
 0x317   :  { %920 = vmatpush.msra.mxu0 %v2128_v19  ;;  %940 = vmatpush.msra.mxu1 %v2131_v8 }
 0x318   :  { %960 = vmatpush.msra.mxu2 %v2422_v12  ;;  %980 = vmatpush.msra.mxu3 %v2423_v13 }
 0x319   :  { %921 = vmatpush.msra.mxu0 %v2136_v9  ;;  %941 = vmatpush.msra.mxu1 %v2139_v55 }
 0x31a   :  { %961 = vmatpush.msra.mxu2 %v2426_v1  ;;  %981 = vmatpush.msra.mxu3 %v2427_v4 }
 0x31b   :  { %922 = vmatpush.msra.mxu0 %v2144_v5  ;;  %942 = vmatpush.msra.mxu1 %v2147_v38  ;;  %v2161_v5 = vld [vmem:[#allocation3 + $0x18] sm:$0xff] }
 0x31c   :  { %962 = vmatpush.msra.mxu2 %v2430_v44  ;;  %982 = vmatpush.msra.mxu3 %v2431_v16  ;;  %2435 = vst [vmem:[#allocation31_spill] sm:$0xff] %v2161_v5 }
 0x31d   :  { %923 = vmatpush.msra.mxu0 %v2152_v56  ;;  %943 = vmatpush.msra.mxu1 %v2155_v0  ;;  %v653_v0 = vld [vmem:[#allocation2 + $0x4] ss:$8 sm:$0xf] }
 0x31e   :  { %963 = vmatpush.msra.mxu2 %v2158_v18  ;;  %983 = vmatpush.msra.mxu3 %v2161_v5 }
 0x37a   :  { %v691_v38 = vpop.f32.mrf.mxu1  ;;  %v671_v9 = vpop.f32.mrf.mxu0 }
 0x37b   :  { %v738_v44 = vrot.slane %v691_v38, 7 }
 0x37d   :  { %v741_v56 = vsel %vm230_vm0, %v671_v9, %v738_v44 }
 0x381   :  { %v711_v4 = vpop.f32.mrf.mxu2  ;;  %v731_v16 = vpop.f32.mrf.mxu3 }
 0x382   :  { %v739_v1 = vrot.slane %v711_v4, 6  ;;  %v740_v55 = vrot.slane %v731_v16, 5 }
 0x384   :  { %v742_v13 = vsel %vm232_vm1, %v739_v1, %v740_v55 }
 0x385   :  { %v743_v12 = vsel %vm234_vm2, %v741_v56, %v742_v13 }
 0x386   :  { %v745_v8 = vadd.f32 %v743_v12, %v653_v0 }
 0x388   :  { %v1189_v18 = vmul.f32 -1.442695, %v745_v8  ;;  %v766_v58 = vrot.slane %v745_v8, 3 }
 0x38a   :  { %1232 = vpow2.f32 %v1189_v18 }
 0x390   :  { %v1233_v19 = vpop.eup %1232 }
 0x391   :  { %v749_v59 = vadd.f32 1.0, %v1233_v19 }
 0x393   :  { %1234 = vrcp.f32 %v749_v59  ;;  %v761_v4 = vand.u32 2147483648, %v749_v59  ;;  %v759_v39 = vand.u32 2147483647, %v749_v59  ;;  %vm755_vm7 = vweird.f32 %v749_v59 }
 0x394   :  { %1236 = vtanh.f32 %v766_v58 }
 0x395   :  { %v762_v55 = vor.u32 1.1754944e-38, %v761_v4  ;;  %vm760_vm9 = vcmp.eq.f32.partialorder %v759_v39, 8.507059e+37 }
 0x399   :  { %v1235_v5 = vpop.eup %1234 }
 0x39a   :  { %v751_v38 = vmul.f32 %v1235_v5, %v749_v59  ;;  %vm756_vm6 = vweird.f32 %v1235_v5  ;;  %v1237_v44 = vpop.eup %1236 }
 0x39b   :  { %vm757_vm8 = vmor %vm755_vm7, %vm756_vm6 }
 0x39c   :  { %v752_v54 = vsub.f32 1.0, %v751_v38 }
 0x39e   :  { %v753_v16 = vmul.f32 %v1235_v5, %v752_v54 }
 0x3a0   :  { %v754_v9 = vadd.f32 %v1235_v5, %v753_v16 }
 0x3a2   :  { %v758_v13 = vsel %vm757_vm8, %v1235_v5, %v754_v9 }
 0x3a3   :  { %v763_v12 = vsel %vm760_vm9, %v762_v55, %v758_v13 }
 0x3a4   :  { %v770_v1 = vrot.slane %v763_v12, 1  ;;  %v773_v56 = vmul.f32 %v1237_v44, %v763_v12  ;;  %v776_v54 = vrot.slane %v763_v12, 2 }
 0x3a6   :  { %v772_v19 = vmul.f32 %v770_v1, %v2073_v17 }
 0x3a8   :  { %v2168_v0 = vadd.f32 %v773_v56, %v772_v19 }
 0x3aa   :  { %1238 = vtanh.f32 %v2168_v0 }
 0x3b0   :  { %v1239_v8 = vpop.eup %1238 }
 0x3b1   :  { %v778_v18 = vmul.f32 %v1239_v8, %v776_v54 }
 0x3b3   :  { %797 = vmatmul.f32.vlgmr.msrb.gmra.mxu0 %v778_v18  ;;  %817 = vmatmul.f32.vlgmr.msrb.gmra.mxu1 %v778_v18 }
 0x3b4   :  { %837 = vmatmul.f32.vlgmr.msrb.gmra.mxu2 %v778_v18  ;;  %857 = vmatmul.f32.vlgmr.msrb.gmra.mxu3 %v778_v18  ;;  %v907_v18 = vld [vmem:[#allocation2 + $0x6] ss:$8 sm:$0xf] }
 0x3b5   :  { %1035 = vmatpush.msrb.mxu0 %v1901_v63  ;;  %1055 = vmatpush.msrb.mxu1 %v1904_v62  ;;  %v2436_v63 = vld [vmem:[#allocation20_spill] sm:$0xff]  ;;  %v2437_v62 = vld [vmem:[#allocation14_spill] sm:$0xff] }
 0x3b6   :  { %1075 = vmatpush.msrb.mxu2 %v1907_v51  ;;  %1095 = vmatpush.msrb.mxu3 %v1910_v60  ;;  %v2438_v51 = vld [vmem:[#allocation13_spill] sm:$0xff] }
 0x3b7   :  { %1036 = vmatpush.msrb.mxu0 %v1913_v61  ;;  %1056 = vmatpush.msrb.mxu1 %v1916_v46  ;;  %v2439_v60 = vld [vmem:[#allocation9_spill] sm:$0xff]  ;;  %v2440_v61 = vld [vmem:[#allocation15_spill] sm:$0xff] }
 0x3b8   :  { %1076 = vmatpush.msrb.mxu2 %v1919_v47  ;;  %1096 = vmatpush.msrb.mxu3 %v1922_v49  ;;  %v2441_v46 = vld [vmem:[#allocation25_spill] sm:$0xff]  ;;  %v2442_v47 = vld [vmem:[#allocation10_spill] sm:$0xff] }
 0x3b9   :  { %1037 = vmatpush.msrb.mxu0 %v1925_v57  ;;  %1057 = vmatpush.msrb.mxu1 %v1928_v52  ;;  %v2443_v49 = vld [vmem:[#allocation17_spill] sm:$0xff]  ;;  %v2444_v57 = vld [vmem:[#allocation24_spill] sm:$0xff]  ;;  %v2445_v52 = vld [vmem:[#allocation18_spill] sm:$0xff] }
 0x3ba   :  { %1077 = vmatpush.msrb.mxu2 %v1931_v2  ;;  %1097 = vmatpush.msrb.mxu3 %v1934_v3  ;;  %v2446_v2 = vld [vmem:[#allocation16_spill] sm:$0xff]  ;;  %v2447_v3 = vld [vmem:[#allocation11_spill] sm:$0xff] }
 0x3bb   :  { %1038 = vmatpush.msrb.mxu0 %v1937_v6  ;;  %1058 = vmatpush.msrb.mxu1 %v1940_v7  ;;  %v2448_v6 = vld [vmem:[#allocation19_spill] sm:$0xff]  ;;  %v2449_v7 = vld [vmem:[#allocation29_spill] sm:$0xff] }
 0x3bc   :  { %1078 = vmatpush.msrb.mxu2 %v1943_v10  ;;  %1098 = vmatpush.msrb.mxu3 %v1946_v11  ;;  %v2450_v10 = vld [vmem:[#allocation12_spill] sm:$0xff]  ;;  %v2451_v11 = vld [vmem:[#allocation21_spill] sm:$0xff] }
 0x3bd   :  { %1039 = vmatpush.msrb.mxu0 %v1949_v14  ;;  %1059 = vmatpush.msrb.mxu1 %v1952_v15  ;;  %v2452_v14 = vld [vmem:[#allocation28_spill] sm:$0xff]  ;;  %v2453_v15 = vld [vmem:[#allocation22_spill] sm:$0xff] }
 0x3be   :  { %1079 = vmatpush.msrb.mxu2 %v1955_v20  ;;  %1099 = vmatpush.msrb.mxu3 %v1958_v21  ;;  %v2454_v20 = vld [vmem:[#allocation23_spill] sm:$0xff] }
 0x3bf   :  { %1040 = vmatpush.msrb.mxu0 %v1961_v22  ;;  %1060 = vmatpush.msrb.mxu1 %v1964_v23  ;;  %v2455_v21 = vld [vmem:[#allocation31_spill] sm:$0xff] }
 0x3c0   :  { %1080 = vmatpush.msrb.mxu2 %v1967_v24  ;;  %1100 = vmatpush.msrb.mxu3 %v1970_v25 }
 0x3c1   :  { %1041 = vmatpush.msrb.mxu0 %v1973_v26  ;;  %1061 = vmatpush.msrb.mxu1 %v1976_v27 }
 0x3c2   :  { %1081 = vmatpush.msrb.mxu2 %v1979_v28  ;;  %1101 = vmatpush.msrb.mxu3 %v1982_v29 }
 0x3c3   :  { %1042 = vmatpush.msrb.mxu0 %v1985_v30  ;;  %1062 = vmatpush.msrb.mxu1 %v1988_v31  ;;  %v780_v31 = vld [vmem:[#allocation2 + $0x5] ss:$8 sm:$0xf] }
 0x3c4   :  { %1082 = vmatpush.msrb.mxu2 %v1991_v32  ;;  %1102 = vmatpush.msrb.mxu3 %v1994_v33 }
 0x3c5   :  { %1043 = vmatpush.msrb.mxu0 %v1997_v34  ;;  %1063 = vmatpush.msrb.mxu1 %v2000_v35 }
 0x3c6   :  { %1083 = vmatpush.msrb.mxu2 %v2003_v36  ;;  %1103 = vmatpush.msrb.mxu3 %v2006_v37 }
 0x3c7   :  { %1044 = vmatpush.msrb.mxu0 %v2009_v40  ;;  %1064 = vmatpush.msrb.mxu1 %v2012_v41 }
 0x3c8   :  { %1084 = vmatpush.msrb.mxu2 %v2015_v45  ;;  %1104 = vmatpush.msrb.mxu3 %v2018_v50 }
 0x3c9   :  { %1045 = vmatpush.msrb.mxu0 %v2021_v43  ;;  %1065 = vmatpush.msrb.mxu1 %v2024_v42 }
 0x3ca   :  { %1085 = vmatpush.msrb.mxu2 %v2027_v48  ;;  %1105 = vmatpush.msrb.mxu3 %v2030_v53 }
 0x3cb   :  { %1046 = vmatpush.msrb.mxu0 %v2436_v63  ;;  %1066 = vmatpush.msrb.mxu1 %v2437_v62 }
 0x3cc   :  { %1086 = vmatpush.msrb.mxu2 %v2438_v51  ;;  %1106 = vmatpush.msrb.mxu3 %v2439_v60 }
 0x3cd   :  { %1047 = vmatpush.msrb.mxu0 %v2440_v61  ;;  %1067 = vmatpush.msrb.mxu1 %v2441_v46 }
 0x3ce   :  { %1087 = vmatpush.msrb.mxu2 %v2442_v47  ;;  %1107 = vmatpush.msrb.mxu3 %v2443_v49 }
 0x3cf   :  { %1048 = vmatpush.msrb.mxu0 %v2444_v57  ;;  %1068 = vmatpush.msrb.mxu1 %v2445_v52 }
 0x3d0   :  { %1088 = vmatpush.msrb.mxu2 %v2446_v2  ;;  %1108 = vmatpush.msrb.mxu3 %v2447_v3 }
 0x3d1   :  { %1049 = vmatpush.msrb.mxu0 %v2448_v6  ;;  %1069 = vmatpush.msrb.mxu1 %v2449_v7 }
 0x3d2   :  { %1089 = vmatpush.msrb.mxu2 %v2450_v10  ;;  %1109 = vmatpush.msrb.mxu3 %v2451_v11 }
 0x3d3   :  { %1050 = vmatpush.msrb.mxu0 %v2452_v14  ;;  %1070 = vmatpush.msrb.mxu1 %v2453_v15 }
 0x3d4   :  { %1090 = vmatpush.msrb.mxu2 %v2454_v20  ;;  %1110 = vmatpush.msrb.mxu3 %v2455_v21 }
 0x430   :  { %v818_v22 = vpop.f32.mrf.mxu1  ;;  %v798_v28 = vpop.f32.mrf.mxu0 }
 0x431   :  { %v865_v23 = vrot.slane %v818_v22, 7 }
 0x433   :  { %v868_v29 = vsel %vm230_vm0, %v798_v28, %v865_v23 }
 0x437   :  { %v838_v24 = vpop.f32.mrf.mxu2  ;;  %v858_v25 = vpop.f32.mrf.mxu3 }
 0x438   :  { %v866_v26 = vrot.slane %v838_v24, 6  ;;  %v867_v27 = vrot.slane %v858_v25, 5 }
 0x43a   :  { %v869_v30 = vsel %vm232_vm1, %v866_v26, %v867_v27 }
 0x43b   :  { %v870_v32 = vsel %vm234_vm2, %v868_v29, %v869_v30 }
 0x43c   :  { %v872_v33 = vadd.f32 %v870_v32, %v780_v31 }
 0x43e   :  { %v1190_v34 = vmul.f32 -1.442695, %v872_v33  ;;  %v893_v41 = vrot.slane %v872_v33, 3 }
 0x440   :  { %1240 = vpow2.f32 %v1190_v34 }
 0x446   :  { %v1241_v35 = vpop.eup %1240 }
 0x447   :  { %v876_v36 = vadd.f32 1.0, %v1241_v35  ;;  %v1034_v35 = vld [vmem:[#allocation2 + $0x7] ss:$8 sm:$0xf] }
 0x449   :  { %1242 = vrcp.f32 %v876_v36  ;;  %v888_v50 = vand.u32 2147483648, %v876_v36  ;;  %v886_v42 = vand.u32 2147483647, %v876_v36  ;;  %vm882_vm11 = vweird.f32 %v876_v36 }
 0x44a   :  { %1244 = vtanh.f32 %v893_v41 }
 0x44b   :  { %v889_v53 = vor.u32 1.1754944e-38, %v888_v50  ;;  %vm887_vm13 = vcmp.eq.f32.partialorder %v886_v42, 8.507059e+37 }
 0x44f   :  { %v1243_v37 = vpop.eup %1242 }
 0x450   :  { %v878_v40 = vmul.f32 %v1243_v37, %v876_v36  ;;  %vm883_vm10 = vweird.f32 %v1243_v37  ;;  %v1245_v59 = vpop.eup %1244 }
 0x451   :  { %vm884_vm12 = vmor %vm882_vm11, %vm883_vm10 }
 0x452   :  { %v879_v45 = vsub.f32 1.0, %v878_v40 }
 0x454   :  { %v880_v43 = vmul.f32 %v1243_v37, %v879_v45 }
 0x456   :  { %v881_v48 = vadd.f32 %v1243_v37, %v880_v43 }
 0x458   :  { %v885_v17 = vsel %vm884_vm12, %v1243_v37, %v881_v48 }
 0x459   :  { %v890_v39 = vsel %vm887_vm13, %v889_v53, %v885_v17 }
 0x45a   :  { %v897_v58 = vrot.slane %v890_v39, 1  ;;  %v900_v38 = vmul.f32 %v1245_v59, %v890_v39  ;;  %v903_v16 = vrot.slane %v890_v39, 2 }
 0x45c   :  { %v899_v5 = vmul.f32 %v897_v58, %v2168_v0 }
 0x45e   :  { %v901_v4 = vadd.f32 %v900_v38, %v899_v5 }
 0x460   :  { %1246 = vtanh.f32 %v901_v4 }
 0x466   :  { %v1247_v9 = vpop.eup %1246 }
 0x467   :  { %v905_v55 = vmul.f32 %v1247_v9, %v903_v16 }
 0x469   :  { %924 = vmatmul.f32.vlgmr.msra.gmra.mxu0 %v905_v55  ;;  %944 = vmatmul.f32.vlgmr.msra.gmra.mxu1 %v905_v55 }
 0x46a   :  { %964 = vmatmul.f32.vlgmr.msra.gmra.mxu2 %v905_v55  ;;  %984 = vmatmul.f32.vlgmr.msra.gmra.mxu3 %v905_v55 }
 0x4e6   :  { %v945_v13 = vpop.f32.mrf.mxu1  ;;  %v925_v54 = vpop.f32.mrf.mxu0 }
 0x4e7   :  { %v992_v12 = vrot.slane %v945_v13, 7 }
 0x4e9   :  { %v995_v8 = vsel %vm230_vm0, %v925_v54, %v992_v12 }
 0x4ed   :  { %v965_v1 = vpop.f32.mrf.mxu2  ;;  %v985_v44 = vpop.f32.mrf.mxu3 }
 0x4ee   :  { %v993_v19 = vrot.slane %v965_v1, 6  ;;  %v994_v56 = vrot.slane %v985_v44, 5  ;;  %v1160_v44 = vld [vmem:[%s2259_s4] sm:$0x1] }
 0x4f0   :  { %v996_v0 = vsel %vm232_vm1, %v993_v19, %v994_v56 }
 0x4f1   :  { %v997_v63 = vsel %vm234_vm2, %v995_v8, %v996_v0  ;;  %v1165_v8 = vld [vmem:[%s2260_s5] sm:$0x1] }
 0x4f2   :  { %v999_v62 = vadd.f32 %v997_v63, %v907_v18 }
 0x4f4   :  { %v1191_v51 = vmul.f32 -1.442695, %v999_v62  ;;  %v1020_v49 = vrot.slane %v999_v62, 3 }
 0x4f6   :  { %1248 = vpow2.f32 %v1191_v51 }
 0x4fc   :  { %v1249_v60 = vpop.eup %1248 }
 0x4fd   :  { %v1003_v61 = vadd.f32 1.0, %v1249_v60 }
 0x4ff   :  { %1250 = vrcp.f32 %v1003_v61  ;;  %v1015_v52 = vand.u32 2147483648, %v1003_v61  ;;  %v1013_v3 = vand.u32 2147483647, %v1003_v61  ;;  %vm1009_vm15 = vweird.f32 %v1003_v61 }
 0x500   :  { %1252 = vtanh.f32 %v1020_v49 }
 0x501   :  { %v1016_v7 = vor.u32 1.1754944e-38, %v1015_v52  ;;  %vm1014_vm4 = vcmp.eq.f32.partialorder %v1013_v3, 8.507059e+37 }
 0x505   :  { %v1251_v46 = vpop.eup %1250 }
 0x506   :  { %v1005_v47 = vmul.f32 %v1251_v46, %v1003_v61  ;;  %vm1010_vm14 = vweird.f32 %v1251_v46  ;;  %v1253_v15 = vpop.eup %1252 }
 0x507   :  { %vm1011_vm3 = vmor %vm1009_vm15, %vm1010_vm14 }
 0x508   :  { %v1006_v57 = vsub.f32 1.0, %v1005_v47 }
 0x50a   :  { %v1007_v2 = vmul.f32 %v1251_v46, %v1006_v57 }
 0x50c   :  { %v1008_v6 = vadd.f32 %v1251_v46, %v1007_v2 }
 0x50e   :  { %v1012_v10 = vsel %vm1011_vm3, %v1251_v46, %v1008_v6 }
 0x50f   :  { %v1017_v11 = vsel %vm1014_vm4, %v1016_v7, %v1012_v10 }
 0x510   :  { %v1024_v14 = vrot.slane %v1017_v11, 1  ;;  %v1027_v21 = vmul.f32 %v1253_v15, %v1017_v11  ;;  %v1030_v23 = vrot.slane %v1017_v11, 2 }
 0x512   :  { %v1026_v20 = vmul.f32 %v1024_v14, %v901_v4 }
 0x514   :  { %v1028_v22 = vadd.f32 %v1027_v21, %v1026_v20 }
 0x516   :  { %1254 = vtanh.f32 %v1028_v22 }
 0x51c   :  { %v1255_v24 = vpop.eup %1254 }
 0x51d   :  { %v1032_v25 = vmul.f32 %v1255_v24, %v1030_v23 }
 0x51f   :  { %1051 = vmatmul.f32.vlgmr.msrb.gmra.mxu0 %v1032_v25  ;;  %1071 = vmatmul.f32.vlgmr.msrb.gmra.mxu1 %v1032_v25 }
 0x520   :  { %1091 = vmatmul.f32.vlgmr.msrb.gmra.mxu2 %v1032_v25  ;;  %1111 = vmatmul.f32.vlgmr.msrb.gmra.mxu3 %v1032_v25 }
 0x59c   :  { %v1072_v26 = vpop.f32.mrf.mxu1  ;;  %v1052_v32 = vpop.f32.mrf.mxu0 }
 0x59d   :  { %v1119_v27 = vrot.slane %v1072_v26, 7 }
 0x59f   :  { %v1122_v33 = vsel %vm230_vm0, %v1052_v32, %v1119_v27 }
 0x5a3   :  { %v1092_v28 = vpop.f32.mrf.mxu2  ;;  %v1112_v29 = vpop.f32.mrf.mxu3 }
 0x5a4   :  { %v1120_v30 = vrot.slane %v1092_v28, 6  ;;  %v1121_v31 = vrot.slane %v1112_v29, 5 }
 0x5a6   :  { %v1123_v34 = vsel %vm232_vm1, %v1120_v30, %v1121_v31 }
 0x5a7   :  { %v1124_v36 = vsel %vm234_vm2, %v1122_v33, %v1123_v34 }
 0x5a8   :  { %v1126_v37 = vadd.f32 %v1124_v36, %v1034_v35 }
 0x5aa   :  { %v1192_v40 = vmul.f32 -1.442695, %v1126_v37  ;;  %v1147_v42 = vrot.slane %v1126_v37, 3 }
 0x5ac   :  { %1256 = vpow2.f32 %v1192_v40 }
 0x5b2   :  { %v1257_v41 = vpop.eup %1256 }
 0x5b3   :  { %v1130_v45 = vadd.f32 1.0, %v1257_v41 }
 0x5b5   :  { %1258 = vrcp.f32 %v1130_v45  ;;  %v1142_v53 = vand.u32 2147483648, %v1130_v45  ;;  %v1140_v39 = vand.u32 2147483647, %v1130_v45  ;;  %vm1136_vm1 = vweird.f32 %v1130_v45 }
 0x5b6   :  { %1260 = vtanh.f32 %v1147_v42 }
 0x5b7   :  { %v1143_v59 = vor.u32 1.1754944e-38, %v1142_v53  ;;  %vm1141_vm2 = vcmp.eq.f32.partialorder %v1140_v39, 8.507059e+37 }
 0x5bb   :  { %v1259_v50 = vpop.eup %1258 }
 0x5bc   :  { %v1132_v43 = vmul.f32 %v1259_v50, %v1130_v45  ;;  %vm1137_vm5 = vweird.f32 %v1259_v50  ;;  %v1261_v16 = vpop.eup %1260 }
 0x5bd   :  { %vm1138_vm6 = vmor %vm1136_vm1, %vm1137_vm5 }
 0x5be   :  { %v1133_v48 = vsub.f32 1.0, %v1132_v43 }
 0x5c0   :  { %v1134_v17 = vmul.f32 %v1259_v50, %v1133_v48 }
 0x5c2   :  { %v1135_v58 = vadd.f32 %v1259_v50, %v1134_v17 }
 0x5c4   :  { %v1139_v5 = vsel %vm1138_vm6, %v1259_v50, %v1135_v58 }
 0x5c5   :  { %v1144_v38 = vsel %vm1141_vm2, %v1143_v59, %v1139_v5 }
 0x5c6   :  { %v1151_v4 = vrot.slane %v1144_v38, 1  ;;  %v1154_v55 = vmul.f32 %v1261_v16, %v1144_v38  ;;  %v1157_v12 = vrot.slane %v1144_v38, 2 }
 0x5c8   :  { %v1153_v9 = vmul.f32 %v1151_v4, %v1028_v22 }
 0x5ca   :  { %v1155_v13 = vadd.f32 %v1154_v55, %v1153_v9 }
 0x5cc   :  { %1262 = vtanh.f32 %v1155_v13 }
 0x5d2   :  { %v1263_v1 = vpop.eup %1262 }
 0x5d3   :  { %v1159_v19 = vmul.f32 %v1263_v1, %v1157_v12 }
 0x5d5   :  { %v1161_v56 = vmul.f32 %v1160_v44, %v1159_v19 }
 0x5d7   :  { %v1162_v54 = vsel %vm230_vm0, %v1161_v56, 0.0 }
 0x5d8   :  { %1163 = vadd.xlane.f32.xlu0 %v1162_v54 }
 0x64b   :  { %v1164_v0 = vpop.xlane.xlu0 %1163 }
 0x64c   :  { %v1166_v18 = vadd.f32 %v1165_v8, %v1164_v0 }
 0x64e   :  { %1167 = vst [vmem:[#allocation6] sm:$0x1] %v1166_v18 }
 0x64f   :  { %1178 = dma.vmem_to_hbm [thread:$0]  %s1174_s11, 16, %s1176_s14, [#allocation5]  }
 0x650   :  { %1378 = dma.done.wait [#allocation5], 16  }
 0x651   :  { %1379 = vsyncadd [#allocation5], 4294967280 }
 0x652   :  { %1183 = vsyncpa [#allocation4], 1 }
 0x653   :  { %1184 = vsyncpa [#allocation5], 1 }

</bundles_post_ra>
